<compile_context>
chip_gen: v5e
topology: v5e:2x2
jax: 0.10.0
libtpu: 0.0.40
codegen_flags: <defaults>
</compile_context>

<pallas_src>
import jax
import jax.numpy as jnp
import numpy as np
from jax.experimental import pallas as pl
from jax.experimental.pallas import tpu as pltpu


def _round_up(x, m):
    return ((x + m - 1) // m) * m


def _sigmoid(x):
    return 1.0 / (1.0 + jnp.exp(-x))


def _make_lstm_kernel(num_layers, hidden_dim, seq_len, batch, batch_pad, emb_dim,
                      out_width):
    L, H, T, B, B_pad, E = num_layers, hidden_dim, seq_len, batch, batch_pad, emb_dim

    def kernel(*refs):
        tok_ref, emb_ref, h0_ref, c0_ref = refs[0], refs[1], refs[2], refs[3]
        idx = 4
        layer_refs = []
        for _ in range(L):
            # (W_ih^T [in, 4H], W_hh^T [H, 4H], bias [1, 4H] = b_ih + b_hh)
            layer_refs.append((refs[idx], refs[idx + 1], refs[idx + 2]))
            idx += 3
        fcw_ref, fcb_ref = refs[idx], refs[idx + 1]
        out_ref = refs[idx + 2]
        x_scr = refs[idx + 3]                       # (T*B_pad, E) VMEM scratch

        # ---- fused embedding gather: build the (T*B_pad, E) layer-0 input ----
        # Token ids are scalars in SMEM; table rows gathered via dynamic
        # leading-axis indexing of the (vocab, 1, E) VMEM table.
        # TODO(synk): for a realistic vocabulary keep the table in HBM
        # (memory_space=pl.ANY) and gather rows by DMA instead of VMEM residency.
        x_scr[...] = jnp.zeros_like(x_scr)          # zeroes the padded batch rows
        for t in range(T):
            for b in range(B):
                x_scr[pl.ds(t * B_pad + b, 1), :] = emb_ref[tok_ref[b, t]]
        x_in = x_scr[...]                           # (T*B_pad, E)

        # Lane mask selecting the "g" (cell candidate) gate lanes of (B_pad, 4H).
        lane = jax.lax.broadcasted_iota(jnp.int32, (B_pad, 4 * H), 1)
        g_mask = (lane >= 2 * H) & (lane < 3 * H)

        pad_rows = None
        if B_pad > B:
            pad_rows = jnp.zeros((B_pad - B, H), jnp.float32)

        hs_fin, cs_fin = [], []
        for l, (wih_ref, whh_ref, b_ref) in enumerate(layer_refs):
            # Hoisted per-layer binds (weights stay resident in vregs).
            w_hh = whh_ref[...]                                       # (H, 4H)
            # Batched input projection for all timesteps at once (off the
            # serial critical path), bias fused here.
            gates_x = jnp.dot(x_in, wih_ref[...],
                              preferred_element_type=jnp.float32) + b_ref[...]

            if pad_rows is not None:
                h = jnp.concatenate([h0_ref[l], pad_rows], axis=0)    # (B_pad, H)
                c = jnp.concatenate([c0_ref[l], pad_rows], axis=0)
            else:
                h = h0_ref[l]
                c = c0_ref[l]

            outs = []
            # T is small and static: full unroll keeps everything visible to the
            # scheduler (switch to lax.fori_loop if T grows beyond a few dozen).
            for t in range(T):
                g = gates_x[t * B_pad:(t + 1) * B_pad, :] + \
                    jnp.dot(h, w_hh, preferred_element_type=jnp.float32)
                # One full-width tanh: sigmoid(x) = 0.5*tanh(x/2) + 0.5.
                pre = jnp.where(g_mask, g, 0.5 * g)
                th = jnp.tanh(pre)
                act = jnp.where(g_mask, th, 0.5 * th + 0.5)
                i_g = act[:, 0 * H:1 * H]
                f_g = act[:, 1 * H:2 * H]
                g_g = act[:, 2 * H:3 * H]
                o_g = act[:, 3 * H:4 * H]
                c = f_g * c + i_g * g_g
                h = o_g * jnp.tanh(c)
                outs.append(h)

            hs_fin.append(h)
            cs_fin.append(c)
            if l + 1 < L:
                x_in = jnp.concatenate(outs, axis=0)   # (T*B_pad, H) -> next layer

        # TODO(synk): dropout is identity (eval mode); train-mode RNG dropout not implemented.
        # fc(H -> 1) as a VPU multiply + lane reduce (avoids an N=1 MXU push).
        logit = jnp.sum(hs_fin[-1] * fcw_ref[...], axis=1, keepdims=True) + fcb_ref[...]
        sig = 0.5 * jnp.tanh(0.5 * logit) + 0.5

        # Single lane-dense output slab: [h_n(0..L-1) | c_n(0..L-1) | sig | pad].
        parts = hs_fin + cs_fin + [sig]
        pad_w = out_width - (2 * L * H + 1)
        if pad_w > 0:
            parts.append(jnp.zeros((B_pad, pad_w), jnp.float32))
        out_ref[...] = jnp.concatenate(parts, axis=1)

    return kernel


def prepare_params(params):
    """One-time weight packing: transposes, fused bias, (vocab,1,E) table layout."""
    L = len(params["w_ih"])
    return {
        # (vocab, 1, E): dynamic gather indexes the untiled leading axis.
        "embedding": jnp.asarray(params["embedding"], jnp.float32)[:, None, :],
        "w_ih_t": [jnp.asarray(params["w_ih"][l].T, jnp.float32) for l in range(L)],   # (in, 4H)
        "w_hh_t": [jnp.asarray(params["w_hh"][l].T, jnp.float32) for l in range(L)],   # (H, 4H)
        "bias": [(params["b_ih"][l] + params["b_hh"][l])[None, :].astype(jnp.float32)  # (1, 4H)
                 for l in range(L)],
        "fc_w": jnp.asarray(params["fc_w"], jnp.float32),                               # (1, H)
        "fc_b": jnp.asarray(params["fc_b"][None, :], jnp.float32),                      # (1, 1)
    }


@jax.jit
def mbti_rnn_forward(x_tokens, hidden, packed):
    """Pallas forward.  Returns (sig_out[B], (h_n[L,B,H], c_n[L,B,H]))."""
    h0, c0 = hidden
    L, B, H = h0.shape
    T = x_tokens.shape[1]
    E = packed["embedding"].shape[-1]
    B_pad = max(8, _round_up(B, 8))                  # full sublane group
    out_w = _round_up(2 * L * H + 1, 128)            # lane-dense output slab width

    kernel_inputs = [x_tokens.astype(jnp.int32), packed["embedding"],
                     h0.astype(jnp.float32), c0.astype(jnp.float32)]
    for l in range(L):
        kernel_inputs += [packed["w_ih_t"][l], packed["w_hh_t"][l], packed["bias"][l]]
    kernel_inputs += [packed["fc_w"], packed["fc_b"]]

    in_specs = ([pl.BlockSpec(memory_space=pltpu.MemorySpace.SMEM)] +          # token ids
                [pl.BlockSpec(memory_space=pltpu.MemorySpace.VMEM)
                 for _ in range(len(kernel_inputs) - 1)])

    slab = pl.pallas_call(
        _make_lstm_kernel(L, H, T, B, B_pad, E, out_w),
        out_shape=jax.ShapeDtypeStruct((B_pad, out_w), jnp.float32),
        in_specs=in_specs,
        out_specs=pl.BlockSpec(memory_space=pltpu.MemorySpace.VMEM),
        scratch_shapes=[pltpu.VMEM((T * B_pad, E), jnp.float32)],
    )(*kernel_inputs)

    hn = jnp.stack([slab[:B, l * H:(l + 1) * H] for l in range(L)])
    cn = jnp.stack([slab[:B, (L + l) * H:(L + l + 1) * H] for l in range(L)])
    sig = slab[:B, 2 * L * H]
    return sig, (hn, cn)


def reference_forward(x_tokens, hidden, params):
    """Pure-JAX reference matching PyTorch LSTM semantics (eval mode)."""
    h, c = hidden
    emb = jnp.take(params["embedding"], x_tokens, axis=0)  # (B, T, E)
    B, T, _ = emb.shape
    L, _, H = h.shape
    hs = [h[l] for l in range(L)]
    cs = [c[l] for l in range(L)]
    last = None
    for t in range(T):
        x_in = emb[:, t, :]
        for l in range(L):
            gates = (x_in @ params["w_ih"][l].T + hs[l] @ params["w_hh"][l].T
                     + params["b_ih"][l] + params["b_hh"][l])
            i_g = _sigmoid(gates[:, :H])
            f_g = _sigmoid(gates[:, H:2 * H])
            g_g = jnp.tanh(gates[:, 2 * H:3 * H])
            o_g = _sigmoid(gates[:, 3 * H:])
            cs[l] = f_g * cs[l] + i_g * g_g
            hs[l] = o_g * jnp.tanh(cs[l])
            x_in = hs[l]
        last = x_in
    logits = last @ params["fc_w"].T + params["fc_b"]
    return _sigmoid(logits)[:, 0], (jnp.stack(hs), jnp.stack(cs))


def init_params(key, no_layers, vocab_size, hidden_dim, embedding_dim):
    keys = jax.random.split(key, 3 + 4 * no_layers)
    k_scale = 1.0 / np.sqrt(hidden_dim)
    params = {
        "embedding": jax.random.normal(keys[0], (vocab_size, embedding_dim),
                                       jnp.float32),
        "fc_w": jax.random.uniform(keys[1], (1, hidden_dim), jnp.float32,
                                   -k_scale, k_scale),
        "fc_b": jax.random.uniform(keys[2], (1,), jnp.float32, -k_scale, k_scale),
        "w_ih": [], "w_hh": [], "b_ih": [], "b_hh": [],
    }
    for l in range(no_layers):
        in_sz = embedding_dim if l == 0 else hidden_dim
        kk = keys[3 + 4 * l: 3 + 4 * (l + 1)]
        params["w_ih"].append(jax.random.uniform(
            kk[0], (4 * hidden_dim, in_sz), jnp.float32, -k_scale, k_scale))
        params["w_hh"].append(jax.random.uniform(
            kk[1], (4 * hidden_dim, hidden_dim), jnp.float32, -k_scale, k_scale))
        params["b_ih"].append(jax.random.uniform(
            kk[2], (4 * hidden_dim,), jnp.float32, -k_scale, k_scale))
        params["b_hh"].append(jax.random.uniform(
            kk[3], (4 * hidden_dim,), jnp.float32, -k_scale, k_scale))
    return params


if __name__ == "__main__":
    no_layers, vocab_size, hidden_dim, embedding_dim = 2, 50, 32, 32
    B, T = 2, 8

    root = jax.random.PRNGKey(0)
    k_params, k_x = jax.random.split(root)
    params = init_params(k_params, no_layers, vocab_size, hidden_dim,
                         embedding_dim)
    packed = prepare_params(params)   # one-time weight packing (outside the hot path)

    x = jax.random.randint(k_x, (B, T), 0, vocab_size, dtype=jnp.int32)
    h0 = jnp.zeros((no_layers, B, hidden_dim), jnp.float32)
    c0 = jnp.zeros((no_layers, B, hidden_dim), jnp.float32)

    sig, (hn, cn) = mbti_rnn_forward(x, (h0, c0), packed)
    jax.block_until_ready((sig, hn, cn))

    sig_r, (hn_r, cn_r) = reference_forward(x, (h0, c0), params)
    assert np.allclose(np.asarray(sig), np.asarray(sig_r), atol=5e-5, rtol=5e-5)
    assert np.allclose(np.asarray(hn), np.asarray(hn_r), atol=5e-5, rtol=5e-5)
    assert np.allclose(np.asarray(cn), np.asarray(cn_r), atol=5e-5, rtol=5e-5)

    print("KERNEL_OK")
</pallas_src>

<mosaic_0001>
module attributes {stable_mosaic.version = 11 : i64} {
  func.func @kernel(%arg0: memref<2x8xi32, #tpu.memory_space<smem>>, %arg1: memref<50x1x32xf32, #tpu.memory_space<vmem>>, %arg2: memref<2x2x32xf32, #tpu.memory_space<vmem>>, %arg3: memref<2x2x32xf32, #tpu.memory_space<vmem>>, %arg4: memref<32x128xf32, #tpu.memory_space<vmem>>, %arg5: memref<32x128xf32, #tpu.memory_space<vmem>>, %arg6: memref<1x128xf32, #tpu.memory_space<vmem>>, %arg7: memref<32x128xf32, #tpu.memory_space<vmem>>, %arg8: memref<32x128xf32, #tpu.memory_space<vmem>>, %arg9: memref<1x128xf32, #tpu.memory_space<vmem>>, %arg10: memref<1x32xf32, #tpu.memory_space<vmem>>, %arg11: memref<1x1xf32, #tpu.memory_space<vmem>>, %arg12: memref<8x256xf32, #tpu.memory_space<vmem>>, %arg13: memref<64x32xf32, #tpu.memory_space<vmem>>) attributes {dimension_semantics = [], scalar_prefetch = 0 : i64, scratch_operands = 1 : i64, tpu.core_type = #tpu.core_type<tc>} {
    %cst = arith.constant 0.000000e+00 : f32
    %0 = vector.broadcast %cst : f32 to vector<64x32xf32>
    %c0 = arith.constant 0 : index
    %c0_0 = arith.constant 0 : index
    %1 = vector.load %arg13[%c0, %c0_0] : memref<64x32xf32, #tpu.memory_space<vmem>>, vector<64x32xf32>
    tpu.vector_store %arg13[%c0, %c0_0], %0 {strides = array<i32>} : memref<64x32xf32, #tpu.memory_space<vmem>>, vector<64x32xf32>,
    %c0_1 = arith.constant 0 : index
    %c0_2 = arith.constant 0 : index
    %2 = memref.load %arg0[%c0_1, %c0_2] : memref<2x8xi32, #tpu.memory_space<smem>>
    %3 = arith.index_cast %2 : i32 to index
    %c0_3 = arith.constant 0 : index
    %c0_4 = arith.constant 0 : index
    %4 = vector.load %arg1[%3, %c0_3, %c0_4] : memref<50x1x32xf32, #tpu.memory_space<vmem>>, vector<1x1x32xf32>
    %5 = vector.shape_cast %4 : vector<1x1x32xf32> to vector<1x32xf32>
    %c0_5 = arith.constant 0 : index
    %c0_6 = arith.constant 0 : index
    %6 = vector.load %arg13[%c0_5, %c0_6] : memref<64x32xf32, #tpu.memory_space<vmem>>, vector<1x32xf32>
    tpu.vector_store %arg13[%c0_5, %c0_6], %5 {strides = array<i32>} : memref<64x32xf32, #tpu.memory_space<vmem>>, vector<1x32xf32>,
    %c1 = arith.constant 1 : index
    %c0_7 = arith.constant 0 : index
    %7 = memref.load %arg0[%c1, %c0_7] : memref<2x8xi32, #tpu.memory_space<smem>>
    %8 = arith.index_cast %7 : i32 to index
    %c0_8 = arith.constant 0 : index
    %c0_9 = arith.constant 0 : index
    %9 = vector.load %arg1[%8, %c0_8, %c0_9] : memref<50x1x32xf32, #tpu.memory_space<vmem>>, vector<1x1x32xf32>
    %10 = vector.shape_cast %9 : vector<1x1x32xf32> to vector<1x32xf32>
    %c1_10 = arith.constant 1 : index
    %c0_11 = arith.constant 0 : index
    %11 = vector.load %arg13[%c1_10, %c0_11] : memref<64x32xf32, #tpu.memory_space<vmem>>, vector<1x32xf32>
    tpu.vector_store %arg13[%c1_10, %c0_11], %10 {strides = array<i32>} : memref<64x32xf32, #tpu.memory_space<vmem>>, vector<1x32xf32>,
    %c0_12 = arith.constant 0 : index
    %c1_13 = arith.constant 1 : index
    %12 = memref.load %arg0[%c0_12, %c1_13] : memref<2x8xi32, #tpu.memory_space<smem>>
    %13 = arith.index_cast %12 : i32 to index
    %c0_14 = arith.constant 0 : index
    %c0_15 = arith.constant 0 : index
    %14 = vector.load %arg1[%13, %c0_14, %c0_15] : memref<50x1x32xf32, #tpu.memory_space<vmem>>, vector<1x1x32xf32>
    %15 = vector.shape_cast %14 : vector<1x1x32xf32> to vector<1x32xf32>
    %c8 = arith.constant 8 : index
    %c0_16 = arith.constant 0 : index
    %16 = vector.load %arg13[%c8, %c0_16] : memref<64x32xf32, #tpu.memory_space<vmem>>, vector<1x32xf32>
    tpu.vector_store %arg13[%c8, %c0_16], %15 {strides = array<i32>} : memref<64x32xf32, #tpu.memory_space<vmem>>, vector<1x32xf32>,
    %c1_17 = arith.constant 1 : index
    %c1_18 = arith.constant 1 : index
    %17 = memref.load %arg0[%c1_17, %c1_18] : memref<2x8xi32, #tpu.memory_space<smem>>
    %18 = arith.index_cast %17 : i32 to index
    %c0_19 = arith.constant 0 : index
    %c0_20 = arith.constant 0 : index
    %19 = vector.load %arg1[%18, %c0_19, %c0_20] : memref<50x1x32xf32, #tpu.memory_space<vmem>>, vector<1x1x32xf32>
    %20 = vector.shape_cast %19 : vector<1x1x32xf32> to vector<1x32xf32>
    %c9 = arith.constant 9 : index
    %c0_21 = arith.constant 0 : index
    %21 = vector.load %arg13[%c9, %c0_21] : memref<64x32xf32, #tpu.memory_space<vmem>>, vector<1x32xf32>
    tpu.vector_store %arg13[%c9, %c0_21], %20 {strides = array<i32>} : memref<64x32xf32, #tpu.memory_space<vmem>>, vector<1x32xf32>,
    %c0_22 = arith.constant 0 : index
    %c2 = arith.constant 2 : index
    %22 = memref.load %arg0[%c0_22, %c2] : memref<2x8xi32, #tpu.memory_space<smem>>
    %23 = arith.index_cast %22 : i32 to index
    %c0_23 = arith.constant 0 : index
    %c0_24 = arith.constant 0 : index
    %24 = vector.load %arg1[%23, %c0_23, %c0_24] : memref<50x1x32xf32, #tpu.memory_space<vmem>>, vector<1x1x32xf32>
    %25 = vector.shape_cast %24 : vector<1x1x32xf32> to vector<1x32xf32>
    %c16 = arith.constant 16 : index
    %c0_25 = arith.constant 0 : index
    %26 = vector.load %arg13[%c16, %c0_25] : memref<64x32xf32, #tpu.memory_space<vmem>>, vector<1x32xf32>
    tpu.vector_store %arg13[%c16, %c0_25], %25 {strides = array<i32>} : memref<64x32xf32, #tpu.memory_space<vmem>>, vector<1x32xf32>,
    %c1_26 = arith.constant 1 : index
    %c2_27 = arith.constant 2 : index
    %27 = memref.load %arg0[%c1_26, %c2_27] : memref<2x8xi32, #tpu.memory_space<smem>>
    %28 = arith.index_cast %27 : i32 to index
    %c0_28 = arith.constant 0 : index
    %c0_29 = arith.constant 0 : index
    %29 = vector.load %arg1[%28, %c0_28, %c0_29] : memref<50x1x32xf32, #tpu.memory_space<vmem>>, vector<1x1x32xf32>
    %30 = vector.shape_cast %29 : vector<1x1x32xf32> to vector<1x32xf32>
    %c17 = arith.constant 17 : index
    %c0_30 = arith.constant 0 : index
    %31 = vector.load %arg13[%c17, %c0_30] : memref<64x32xf32, #tpu.memory_space<vmem>>, vector<1x32xf32>
    tpu.vector_store %arg13[%c17, %c0_30], %30 {strides = array<i32>} : memref<64x32xf32, #tpu.memory_space<vmem>>, vector<1x32xf32>,
    %c0_31 = arith.constant 0 : index
    %c3 = arith.constant 3 : index
    %32 = memref.load %arg0[%c0_31, %c3] : memref<2x8xi32, #tpu.memory_space<smem>>
    %33 = arith.index_cast %32 : i32 to index
    %c0_32 = arith.constant 0 : index
    %c0_33 = arith.constant 0 : index
    %34 = vector.load %arg1[%33, %c0_32, %c0_33] : memref<50x1x32xf32, #tpu.memory_space<vmem>>, vector<1x1x32xf32>
    %35 = vector.shape_cast %34 : vector<1x1x32xf32> to vector<1x32xf32>
    %c24 = arith.constant 24 : index
    %c0_34 = arith.constant 0 : index
    %36 = vector.load %arg13[%c24, %c0_34] : memref<64x32xf32, #tpu.memory_space<vmem>>, vector<1x32xf32>
    tpu.vector_store %arg13[%c24, %c0_34], %35 {strides = array<i32>} : memref<64x32xf32, #tpu.memory_space<vmem>>, vector<1x32xf32>,
    %c1_35 = arith.constant 1 : index
    %c3_36 = arith.constant 3 : index
    %37 = memref.load %arg0[%c1_35, %c3_36] : memref<2x8xi32, #tpu.memory_space<smem>>
    %38 = arith.index_cast %37 : i32 to index
    %c0_37 = arith.constant 0 : index
    %c0_38 = arith.constant 0 : index
    %39 = vector.load %arg1[%38, %c0_37, %c0_38] : memref<50x1x32xf32, #tpu.memory_space<vmem>>, vector<1x1x32xf32>
    %40 = vector.shape_cast %39 : vector<1x1x32xf32> to vector<1x32xf32>
    %c25 = arith.constant 25 : index
    %c0_39 = arith.constant 0 : index
    %41 = vector.load %arg13[%c25, %c0_39] : memref<64x32xf32, #tpu.memory_space<vmem>>, vector<1x32xf32>
    tpu.vector_store %arg13[%c25, %c0_39], %40 {strides = array<i32>} : memref<64x32xf32, #tpu.memory_space<vmem>>, vector<1x32xf32>,
    %c0_40 = arith.constant 0 : index
    %c4 = arith.constant 4 : index
    %42 = memref.load %arg0[%c0_40, %c4] : memref<2x8xi32, #tpu.memory_space<smem>>
    %43 = arith.index_cast %42 : i32 to index
    %c0_41 = arith.constant 0 : index
    %c0_42 = arith.constant 0 : index
    %44 = vector.load %arg1[%43, %c0_41, %c0_42] : memref<50x1x32xf32, #tpu.memory_space<vmem>>, vector<1x1x32xf32>
    %45 = vector.shape_cast %44 : vector<1x1x32xf32> to vector<1x32xf32>
    %c32 = arith.constant 32 : index
    %c0_43 = arith.constant 0 : index
    %46 = vector.load %arg13[%c32, %c0_43] : memref<64x32xf32, #tpu.memory_space<vmem>>, vector<1x32xf32>
    tpu.vector_store %arg13[%c32, %c0_43], %45 {strides = array<i32>} : memref<64x32xf32, #tpu.memory_space<vmem>>, vector<1x32xf32>,
    %c1_44 = arith.constant 1 : index
    %c4_45 = arith.constant 4 : index
    %47 = memref.load %arg0[%c1_44, %c4_45] : memref<2x8xi32, #tpu.memory_space<smem>>
    %48 = arith.index_cast %47 : i32 to index
    %c0_46 = arith.constant 0 : index
    %c0_47 = arith.constant 0 : index
    %49 = vector.load %arg1[%48, %c0_46, %c0_47] : memref<50x1x32xf32, #tpu.memory_space<vmem>>, vector<1x1x32xf32>
    %50 = vector.shape_cast %49 : vector<1x1x32xf32> to vector<1x32xf32>
    %c33 = arith.constant 33 : index
    %c0_48 = arith.constant 0 : index
    %51 = vector.load %arg13[%c33, %c0_48] : memref<64x32xf32, #tpu.memory_space<vmem>>, vector<1x32xf32>
    tpu.vector_store %arg13[%c33, %c0_48], %50 {strides = array<i32>} : memref<64x32xf32, #tpu.memory_space<vmem>>, vector<1x32xf32>,
    %c0_49 = arith.constant 0 : index
    %c5 = arith.constant 5 : index
    %52 = memref.load %arg0[%c0_49, %c5] : memref<2x8xi32, #tpu.memory_space<smem>>
    %53 = arith.index_cast %52 : i32 to index
    %c0_50 = arith.constant 0 : index
    %c0_51 = arith.constant 0 : index
    %54 = vector.load %arg1[%53, %c0_50, %c0_51] : memref<50x1x32xf32, #tpu.memory_space<vmem>>, vector<1x1x32xf32>
    %55 = vector.shape_cast %54 : vector<1x1x32xf32> to vector<1x32xf32>
    %c40 = arith.constant 40 : index
    %c0_52 = arith.constant 0 : index
    %56 = vector.load %arg13[%c40, %c0_52] : memref<64x32xf32, #tpu.memory_space<vmem>>, vector<1x32xf32>
    tpu.vector_store %arg13[%c40, %c0_52], %55 {strides = array<i32>} : memref<64x32xf32, #tpu.memory_space<vmem>>, vector<1x32xf32>,
    %c1_53 = arith.constant 1 : index
    %c5_54 = arith.constant 5 : index
    %57 = memref.load %arg0[%c1_53, %c5_54] : memref<2x8xi32, #tpu.memory_space<smem>>
    %58 = arith.index_cast %57 : i32 to index
    %c0_55 = arith.constant 0 : index
    %c0_56 = arith.constant 0 : index
    %59 = vector.load %arg1[%58, %c0_55, %c0_56] : memref<50x1x32xf32, #tpu.memory_space<vmem>>, vector<1x1x32xf32>
    %60 = vector.shape_cast %59 : vector<1x1x32xf32> to vector<1x32xf32>
    %c41 = arith.constant 41 : index
    %c0_57 = arith.constant 0 : index
    %61 = vector.load %arg13[%c41, %c0_57] : memref<64x32xf32, #tpu.memory_space<vmem>>, vector<1x32xf32>
    tpu.vector_store %arg13[%c41, %c0_57], %60 {strides = array<i32>} : memref<64x32xf32, #tpu.memory_space<vmem>>, vector<1x32xf32>,
    %c0_58 = arith.constant 0 : index
    %c6 = arith.constant 6 : index
    %62 = memref.load %arg0[%c0_58, %c6] : memref<2x8xi32, #tpu.memory_space<smem>>
    %63 = arith.index_cast %62 : i32 to index
    %c0_59 = arith.constant 0 : index
    %c0_60 = arith.constant 0 : index
    %64 = vector.load %arg1[%63, %c0_59, %c0_60] : memref<50x1x32xf32, #tpu.memory_space<vmem>>, vector<1x1x32xf32>
    %65 = vector.shape_cast %64 : vector<1x1x32xf32> to vector<1x32xf32>
    %c48 = arith.constant 48 : index
    %c0_61 = arith.constant 0 : index
    %66 = vector.load %arg13[%c48, %c0_61] : memref<64x32xf32, #tpu.memory_space<vmem>>, vector<1x32xf32>
    tpu.vector_store %arg13[%c48, %c0_61], %65 {strides = array<i32>} : memref<64x32xf32, #tpu.memory_space<vmem>>, vector<1x32xf32>,
    %c1_62 = arith.constant 1 : index
    %c6_63 = arith.constant 6 : index
    %67 = memref.load %arg0[%c1_62, %c6_63] : memref<2x8xi32, #tpu.memory_space<smem>>
    %68 = arith.index_cast %67 : i32 to index
    %c0_64 = arith.constant 0 : index
    %c0_65 = arith.constant 0 : index
    %69 = vector.load %arg1[%68, %c0_64, %c0_65] : memref<50x1x32xf32, #tpu.memory_space<vmem>>, vector<1x1x32xf32>
    %70 = vector.shape_cast %69 : vector<1x1x32xf32> to vector<1x32xf32>
    %c49 = arith.constant 49 : index
    %c0_66 = arith.constant 0 : index
    %71 = vector.load %arg13[%c49, %c0_66] : memref<64x32xf32, #tpu.memory_space<vmem>>, vector<1x32xf32>
    tpu.vector_store %arg13[%c49, %c0_66], %70 {strides = array<i32>} : memref<64x32xf32, #tpu.memory_space<vmem>>, vector<1x32xf32>,
    %c0_67 = arith.constant 0 : index
    %c7 = arith.constant 7 : index
    %72 = memref.load %arg0[%c0_67, %c7] : memref<2x8xi32, #tpu.memory_space<smem>>
    %73 = arith.index_cast %72 : i32 to index
    %c0_68 = arith.constant 0 : index
    %c0_69 = arith.constant 0 : index
    %74 = vector.load %arg1[%73, %c0_68, %c0_69] : memref<50x1x32xf32, #tpu.memory_space<vmem>>, vector<1x1x32xf32>
    %75 = vector.shape_cast %74 : vector<1x1x32xf32> to vector<1x32xf32>
    %c56 = arith.constant 56 : index
    %c0_70 = arith.constant 0 : index
    %76 = vector.load %arg13[%c56, %c0_70] : memref<64x32xf32, #tpu.memory_space<vmem>>, vector<1x32xf32>
    tpu.vector_store %arg13[%c56, %c0_70], %75 {strides = array<i32>} : memref<64x32xf32, #tpu.memory_space<vmem>>, vector<1x32xf32>,
    %c1_71 = arith.constant 1 : index
    %c7_72 = arith.constant 7 : index
    %77 = memref.load %arg0[%c1_71, %c7_72] : memref<2x8xi32, #tpu.memory_space<smem>>
    %78 = arith.index_cast %77 : i32 to index
    %c0_73 = arith.constant 0 : index
    %c0_74 = arith.constant 0 : index
    %79 = vector.load %arg1[%78, %c0_73, %c0_74] : memref<50x1x32xf32, #tpu.memory_space<vmem>>, vector<1x1x32xf32>
    %80 = vector.shape_cast %79 : vector<1x1x32xf32> to vector<1x32xf32>
    %c57 = arith.constant 57 : index
    %c0_75 = arith.constant 0 : index
    %81 = vector.load %arg13[%c57, %c0_75] : memref<64x32xf32, #tpu.memory_space<vmem>>, vector<1x32xf32>
    tpu.vector_store %arg13[%c57, %c0_75], %80 {strides = array<i32>} : memref<64x32xf32, #tpu.memory_space<vmem>>, vector<1x32xf32>,
    %c0_76 = arith.constant 0 : index
    %c0_77 = arith.constant 0 : index
    %82 = vector.load %arg13[%c0_76, %c0_77] : memref<64x32xf32, #tpu.memory_space<vmem>>, vector<64x32xf32>
    %83 = tpu.iota {dimensions = array<i32: 1>} : vector<8x128xi32>
    %c64_i32 = arith.constant 64 : i32
    %84 = vector.broadcast %c64_i32 : i32 to vector<8x128xi32>
    %85 = arith.cmpi sge, %83, %84 : vector<8x128xi32>
    %c96_i32 = arith.constant 96 : i32
    %86 = vector.broadcast %c96_i32 : i32 to vector<8x128xi32>
    %87 = arith.cmpi slt, %83, %86 : vector<8x128xi32>
    %88 = arith.andi %85, %87 : vector<8x128xi1>
    %cst_78 = arith.constant 0.000000e+00 : f32
    %89 = vector.broadcast %cst_78 : f32 to vector<6x32xf32>
    %c0_79 = arith.constant 0 : index
    %c0_80 = arith.constant 0 : index
    %90 = vector.load %arg5[%c0_79, %c0_80] : memref<32x128xf32, #tpu.memory_space<vmem>>, vector<32x128xf32>
    %c0_81 = arith.constant 0 : index
    %c0_82 = arith.constant 0 : index
    %91 = vector.load %arg4[%c0_81, %c0_82] : memref<32x128xf32, #tpu.memory_space<vmem>>, vector<32x128xf32>
    %cst_83 = arith.constant dense<0.000000e+00> : vector<64x128xf32>
    %92 = tpu.matmul %82, %91, %cst_83 {dimension_numbers = #tpu.dot_dimension_numbers<[1], [0], [0], [1], [0, 0, 1, 1], [], []>} : vector<64x32xf32>, vector<32x128xf32>, vector<64x128xf32> -> vector<64x128xf32>
    %c0_84 = arith.constant 0 : index
    %c0_85 = arith.constant 0 : index
    %93 = vector.load %arg6[%c0_84, %c0_85] : memref<1x128xf32, #tpu.memory_space<vmem>>, vector<1x128xf32>
    %94 = vector.broadcast %93 : vector<1x128xf32> to vector<64x128xf32>
    %95 = arith.addf %92, %94 : vector<64x128xf32>
    %c0_86 = arith.constant 0 : index
    %c0_87 = arith.constant 0 : index
    %c0_88 = arith.constant 0 : index
    %96 = vector.load %arg2[%c0_86, %c0_87, %c0_88] : memref<2x2x32xf32, #tpu.memory_space<vmem>>, vector<1x2x32xf32>
    %97 = vector.shape_cast %96 : vector<1x2x32xf32> to vector<2x32xf32>
    %98 = tpu.concatenate %97, %89 in 0 : vector<2x32xf32>, vector<6x32xf32> -> vector<8x32xf32>
    %c0_89 = arith.constant 0 : index
    %c0_90 = arith.constant 0 : index
    %c0_91 = arith.constant 0 : index
    %99 = vector.load %arg3[%c0_89, %c0_90, %c0_91] : memref<2x2x32xf32, #tpu.memory_space<vmem>>, vector<1x2x32xf32>
    %100 = vector.shape_cast %99 : vector<1x2x32xf32> to vector<2x32xf32>
    %101 = tpu.concatenate %100, %89 in 0 : vector<2x32xf32>, vector<6x32xf32> -> vector<8x32xf32>
    %102 = vector.extract_strided_slice %95 {offsets = [0, 0], sizes = [8, 128], strides = [1, 1]} : vector<64x128xf32> to vector<8x128xf32>
    %cst_92 = arith.constant dense<0.000000e+00> : vector<8x128xf32>
    %103 = tpu.matmul %98, %90, %cst_92 {dimension_numbers = #tpu.dot_dimension_numbers<[1], [0], [0], [1], [0, 0, 1, 1], [], []>} : vector<8x32xf32>, vector<32x128xf32>, vector<8x128xf32> -> vector<8x128xf32>
    %104 = arith.addf %102, %103 : vector<8x128xf32>
    %cst_93 = arith.constant 5.000000e-01 : f32
    %105 = vector.broadcast %cst_93 : f32 to vector<8x128xf32>
    %106 = arith.mulf %105, %104 : vector<8x128xf32>
    %107 = arith.select %88, %104, %106 : vector<8x128xi1>, vector<8x128xf32>
    %108 = math.tanh %107 : vector<8x128xf32>
    %cst_94 = arith.constant 5.000000e-01 : f32
    %109 = vector.broadcast %cst_94 : f32 to vector<8x128xf32>
    %110 = arith.mulf %109, %108 : vector<8x128xf32>
    %cst_95 = arith.constant 5.000000e-01 : f32
    %111 = vector.broadcast %cst_95 : f32 to vector<8x128xf32>
    %112 = arith.addf %110, %111 : vector<8x128xf32>
    %113 = arith.select %88, %108, %112 : vector<8x128xi1>, vector<8x128xf32>
    %114 = vector.extract_strided_slice %113 {offsets = [0, 0], sizes = [8, 32], strides = [1, 1]} : vector<8x128xf32> to vector<8x32xf32>
    %115 = vector.extract_strided_slice %113 {offsets = [0, 32], sizes = [8, 32], strides = [1, 1]} : vector<8x128xf32> to vector<8x32xf32>
    %116 = vector.extract_strided_slice %113 {offsets = [0, 64], sizes = [8, 32], strides = [1, 1]} : vector<8x128xf32> to vector<8x32xf32>
    %117 = vector.extract_strided_slice %113 {offsets = [0, 96], sizes = [8, 32], strides = [1, 1]} : vector<8x128xf32> to vector<8x32xf32>
    %118 = arith.mulf %115, %101 : vector<8x32xf32>
    %119 = arith.mulf %114, %116 : vector<8x32xf32>
    %120 = arith.addf %118, %119 : vector<8x32xf32>
    %121 = math.tanh %120 : vector<8x32xf32>
    %122 = arith.mulf %117, %121 : vector<8x32xf32>
    %123 = vector.extract_strided_slice %95 {offsets = [8, 0], sizes = [8, 128], strides = [1, 1]} : vector<64x128xf32> to vector<8x128xf32>
    %cst_96 = arith.constant dense<0.000000e+00> : vector<8x128xf32>
    %124 = tpu.matmul %122, %90, %cst_96 {dimension_numbers = #tpu.dot_dimension_numbers<[1], [0], [0], [1], [0, 0, 1, 1], [], []>} : vector<8x32xf32>, vector<32x128xf32>, vector<8x128xf32> -> vector<8x128xf32>
    %125 = arith.addf %123, %124 : vector<8x128xf32>
    %cst_97 = arith.constant 5.000000e-01 : f32
    %126 = vector.broadcast %cst_97 : f32 to vector<8x128xf32>
    %127 = arith.mulf %126, %125 : vector<8x128xf32>
    %128 = arith.select %88, %125, %127 : vector<8x128xi1>, vector<8x128xf32>
    %129 = math.tanh %128 : vector<8x128xf32>
    %cst_98 = arith.constant 5.000000e-01 : f32
    %130 = vector.broadcast %cst_98 : f32 to vector<8x128xf32>
    %131 = arith.mulf %130, %129 : vector<8x128xf32>
    %cst_99 = arith.constant 5.000000e-01 : f32
    %132 = vector.broadcast %cst_99 : f32 to vector<8x128xf32>
    %133 = arith.addf %131, %132 : vector<8x128xf32>
    %134 = arith.select %88, %129, %133 : vector<8x128xi1>, vector<8x128xf32>
    %135 = vector.extract_strided_slice %134 {offsets = [0, 0], sizes = [8, 32], strides = [1, 1]} : vector<8x128xf32> to vector<8x32xf32>
    %136 = vector.extract_strided_slice %134 {offsets = [0, 32], sizes = [8, 32], strides = [1, 1]} : vector<8x128xf32> to vector<8x32xf32>
    %137 = vector.extract_strided_slice %134 {offsets = [0, 64], sizes = [8, 32], strides = [1, 1]} : vector<8x128xf32> to vector<8x32xf32>
    %138 = vector.extract_strided_slice %134 {offsets = [0, 96], sizes = [8, 32], strides = [1, 1]} : vector<8x128xf32> to vector<8x32xf32>
    %139 = arith.mulf %136, %120 : vector<8x32xf32>
    %140 = arith.mulf %135, %137 : vector<8x32xf32>
    %141 = arith.addf %139, %140 : vector<8x32xf32>
    %142 = math.tanh %141 : vector<8x32xf32>
    %143 = arith.mulf %138, %142 : vector<8x32xf32>
    %144 = vector.extract_strided_slice %95 {offsets = [16, 0], sizes = [8, 128], strides = [1, 1]} : vector<64x128xf32> to vector<8x128xf32>
    %cst_100 = arith.constant dense<0.000000e+00> : vector<8x128xf32>
    %145 = tpu.matmul %143, %90, %cst_100 {dimension_numbers = #tpu.dot_dimension_numbers<[1], [0], [0], [1], [0, 0, 1, 1], [], []>} : vector<8x32xf32>, vector<32x128xf32>, vector<8x128xf32> -> vector<8x128xf32>
    %146 = arith.addf %144, %145 : vector<8x128xf32>
    %cst_101 = arith.constant 5.000000e-01 : f32
    %147 = vector.broadcast %cst_101 : f32 to vector<8x128xf32>
    %148 = arith.mulf %147, %146 : vector<8x128xf32>
    %149 = arith.select %88, %146, %148 : vector<8x128xi1>, vector<8x128xf32>
    %150 = math.tanh %149 : vector<8x128xf32>
    %cst_102 = arith.constant 5.000000e-01 : f32
    %151 = vector.broadcast %cst_102 : f32 to vector<8x128xf32>
    %152 = arith.mulf %151, %150 : vector<8x128xf32>
    %cst_103 = arith.constant 5.000000e-01 : f32
    %153 = vector.broadcast %cst_103 : f32 to vector<8x128xf32>
    %154 = arith.addf %152, %153 : vector<8x128xf32>
    %155 = arith.select %88, %150, %154 : vector<8x128xi1>, vector<8x128xf32>
    %156 = vector.extract_strided_slice %155 {offsets = [0, 0], sizes = [8, 32], strides = [1, 1]} : vector<8x128xf32> to vector<8x32xf32>
    %157 = vector.extract_strided_slice %155 {offsets = [0, 32], sizes = [8, 32], strides = [1, 1]} : vector<8x128xf32> to vector<8x32xf32>
    %158 = vector.extract_strided_slice %155 {offsets = [0, 64], sizes = [8, 32], strides = [1, 1]} : vector<8x128xf32> to vector<8x32xf32>
    %159 = vector.extract_strided_slice %155 {offsets = [0, 96], sizes = [8, 32], strides = [1, 1]} : vector<8x128xf32> to vector<8x32xf32>
    %160 = arith.mulf %157, %141 : vector<8x32xf32>
    %161 = arith.mulf %156, %158 : vector<8x32xf32>
    %162 = arith.addf %160, %161 : vector<8x32xf32>
    %163 = math.tanh %162 : vector<8x32xf32>
    %164 = arith.mulf %159, %163 : vector<8x32xf32>
    %165 = vector.extract_strided_slice %95 {offsets = [24, 0], sizes = [8, 128], strides = [1, 1]} : vector<64x128xf32> to vector<8x128xf32>
    %cst_104 = arith.constant dense<0.000000e+00> : vector<8x128xf32>
    %166 = tpu.matmul %164, %90, %cst_104 {dimension_numbers = #tpu.dot_dimension_numbers<[1], [0], [0], [1], [0, 0, 1, 1], [], []>} : vector<8x32xf32>, vector<32x128xf32>, vector<8x128xf32> -> vector<8x128xf32>
    %167 = arith.addf %165, %166 : vector<8x128xf32>
    %cst_105 = arith.constant 5.000000e-01 : f32
    %168 = vector.broadcast %cst_105 : f32 to vector<8x128xf32>
    %169 = arith.mulf %168, %167 : vector<8x128xf32>
    %170 = arith.select %88, %167, %169 : vector<8x128xi1>, vector<8x128xf32>
    %171 = math.tanh %170 : vector<8x128xf32>
    %cst_106 = arith.constant 5.000000e-01 : f32
    %172 = vector.broadcast %cst_106 : f32 to vector<8x128xf32>
    %173 = arith.mulf %172, %171 : vector<8x128xf32>
    %cst_107 = arith.constant 5.000000e-01 : f32
    %174 = vector.broadcast %cst_107 : f32 to vector<8x128xf32>
    %175 = arith.addf %173, %174 : vector<8x128xf32>
    %176 = arith.select %88, %171, %175 : vector<8x128xi1>, vector<8x128xf32>
    %177 = vector.extract_strided_slice %176 {offsets = [0, 0], sizes = [8, 32], strides = [1, 1]} : vector<8x128xf32> to vector<8x32xf32>
    %178 = vector.extract_strided_slice %176 {offsets = [0, 32], sizes = [8, 32], strides = [1, 1]} : vector<8x128xf32> to vector<8x32xf32>
    %179 = vector.extract_strided_slice %176 {offsets = [0, 64], sizes = [8, 32], strides = [1, 1]} : vector<8x128xf32> to vector<8x32xf32>
    %180 = vector.extract_strided_slice %176 {offsets = [0, 96], sizes = [8, 32], strides = [1, 1]} : vector<8x128xf32> to vector<8x32xf32>
    %181 = arith.mulf %178, %162 : vector<8x32xf32>
    %182 = arith.mulf %177, %179 : vector<8x32xf32>
    %183 = arith.addf %181, %182 : vector<8x32xf32>
    %184 = math.tanh %183 : vector<8x32xf32>
    %185 = arith.mulf %180, %184 : vector<8x32xf32>
    %186 = vector.extract_strided_slice %95 {offsets = [32, 0], sizes = [8, 128], strides = [1, 1]} : vector<64x128xf32> to vector<8x128xf32>
    %cst_108 = arith.constant dense<0.000000e+00> : vector<8x128xf32>
    %187 = tpu.matmul %185, %90, %cst_108 {dimension_numbers = #tpu.dot_dimension_numbers<[1], [0], [0], [1], [0, 0, 1, 1], [], []>} : vector<8x32xf32>, vector<32x128xf32>, vector<8x128xf32> -> vector<8x128xf32>
    %188 = arith.addf %186, %187 : vector<8x128xf32>
    %cst_109 = arith.constant 5.000000e-01 : f32
    %189 = vector.broadcast %cst_109 : f32 to vector<8x128xf32>
    %190 = arith.mulf %189, %188 : vector<8x128xf32>
    %191 = arith.select %88, %188, %190 : vector<8x128xi1>, vector<8x128xf32>
    %192 = math.tanh %191 : vector<8x128xf32>
    %cst_110 = arith.constant 5.000000e-01 : f32
    %193 = vector.broadcast %cst_110 : f32 to vector<8x128xf32>
    %194 = arith.mulf %193, %192 : vector<8x128xf32>
    %cst_111 = arith.constant 5.000000e-01 : f32
    %195 = vector.broadcast %cst_111 : f32 to vector<8x128xf32>
    %196 = arith.addf %194, %195 : vector<8x128xf32>
    %197 = arith.select %88, %192, %196 : vector<8x128xi1>, vector<8x128xf32>
    %198 = vector.extract_strided_slice %197 {offsets = [0, 0], sizes = [8, 32], strides = [1, 1]} : vector<8x128xf32> to vector<8x32xf32>
    %199 = vector.extract_strided_slice %197 {offsets = [0, 32], sizes = [8, 32], strides = [1, 1]} : vector<8x128xf32> to vector<8x32xf32>
    %200 = vector.extract_strided_slice %197 {offsets = [0, 64], sizes = [8, 32], strides = [1, 1]} : vector<8x128xf32> to vector<8x32xf32>
    %201 = vector.extract_strided_slice %197 {offsets = [0, 96], sizes = [8, 32], strides = [1, 1]} : vector<8x128xf32> to vector<8x32xf32>
    %202 = arith.mulf %199, %183 : vector<8x32xf32>
    %203 = arith.mulf %198, %200 : vector<8x32xf32>
    %204 = arith.addf %202, %203 : vector<8x32xf32>
    %205 = math.tanh %204 : vector<8x32xf32>
    %206 = arith.mulf %201, %205 : vector<8x32xf32>
    %207 = vector.extract_strided_slice %95 {offsets = [40, 0], sizes = [8, 128], strides = [1, 1]} : vector<64x128xf32> to vector<8x128xf32>
    %cst_112 = arith.constant dense<0.000000e+00> : vector<8x128xf32>
    %208 = tpu.matmul %206, %90, %cst_112 {dimension_numbers = #tpu.dot_dimension_numbers<[1], [0], [0], [1], [0, 0, 1, 1], [], []>} : vector<8x32xf32>, vector<32x128xf32>, vector<8x128xf32> -> vector<8x128xf32>
    %209 = arith.addf %207, %208 : vector<8x128xf32>
    %cst_113 = arith.constant 5.000000e-01 : f32
    %210 = vector.broadcast %cst_113 : f32 to vector<8x128xf32>
    %211 = arith.mulf %210, %209 : vector<8x128xf32>
    %212 = arith.select %88, %209, %211 : vector<8x128xi1>, vector<8x128xf32>
    %213 = math.tanh %212 : vector<8x128xf32>
    %cst_114 = arith.constant 5.000000e-01 : f32
    %214 = vector.broadcast %cst_114 : f32 to vector<8x128xf32>
    %215 = arith.mulf %214, %213 : vector<8x128xf32>
    %cst_115 = arith.constant 5.000000e-01 : f32
    %216 = vector.broadcast %cst_115 : f32 to vector<8x128xf32>
    %217 = arith.addf %215, %216 : vector<8x128xf32>
    %218 = arith.select %88, %213, %217 : vector<8x128xi1>, vector<8x128xf32>
    %219 = vector.extract_strided_slice %218 {offsets = [0, 0], sizes = [8, 32], strides = [1, 1]} : vector<8x128xf32> to vector<8x32xf32>
    %220 = vector.extract_strided_slice %218 {offsets = [0, 32], sizes = [8, 32], strides = [1, 1]} : vector<8x128xf32> to vector<8x32xf32>
    %221 = vector.extract_strided_slice %218 {offsets = [0, 64], sizes = [8, 32], strides = [1, 1]} : vector<8x128xf32> to vector<8x32xf32>
    %222 = vector.extract_strided_slice %218 {offsets = [0, 96], sizes = [8, 32], strides = [1, 1]} : vector<8x128xf32> to vector<8x32xf32>
    %223 = arith.mulf %220, %204 : vector<8x32xf32>
    %224 = arith.mulf %219, %221 : vector<8x32xf32>
    %225 = arith.addf %223, %224 : vector<8x32xf32>
    %226 = math.tanh %225 : vector<8x32xf32>
    %227 = arith.mulf %222, %226 : vector<8x32xf32>
    %228 = vector.extract_strided_slice %95 {offsets = [48, 0], sizes = [8, 128], strides = [1, 1]} : vector<64x128xf32> to vector<8x128xf32>
    %cst_116 = arith.constant dense<0.000000e+00> : vector<8x128xf32>
    %229 = tpu.matmul %227, %90, %cst_116 {dimension_numbers = #tpu.dot_dimension_numbers<[1], [0], [0], [1], [0, 0, 1, 1], [], []>} : vector<8x32xf32>, vector<32x128xf32>, vector<8x128xf32> -> vector<8x128xf32>
    %230 = arith.addf %228, %229 : vector<8x128xf32>
    %cst_117 = arith.constant 5.000000e-01 : f32
    %231 = vector.broadcast %cst_117 : f32 to vector<8x128xf32>
    %232 = arith.mulf %231, %230 : vector<8x128xf32>
    %233 = arith.select %88, %230, %232 : vector<8x128xi1>, vector<8x128xf32>
    %234 = math.tanh %233 : vector<8x128xf32>
    %cst_118 = arith.constant 5.000000e-01 : f32
    %235 = vector.broadcast %cst_118 : f32 to vector<8x128xf32>
    %236 = arith.mulf %235, %234 : vector<8x128xf32>
    %cst_119 = arith.constant 5.000000e-01 : f32
    %237 = vector.broadcast %cst_119 : f32 to vector<8x128xf32>
    %238 = arith.addf %236, %237 : vector<8x128xf32>
    %239 = arith.select %88, %234, %238 : vector<8x128xi1>, vector<8x128xf32>
    %240 = vector.extract_strided_slice %239 {offsets = [0, 0], sizes = [8, 32], strides = [1, 1]} : vector<8x128xf32> to vector<8x32xf32>
    %241 = vector.extract_strided_slice %239 {offsets = [0, 32], sizes = [8, 32], strides = [1, 1]} : vector<8x128xf32> to vector<8x32xf32>
    %242 = vector.extract_strided_slice %239 {offsets = [0, 64], sizes = [8, 32], strides = [1, 1]} : vector<8x128xf32> to vector<8x32xf32>
    %243 = vector.extract_strided_slice %239 {offsets = [0, 96], sizes = [8, 32], strides = [1, 1]} : vector<8x128xf32> to vector<8x32xf32>
    %244 = arith.mulf %241, %225 : vector<8x32xf32>
    %245 = arith.mulf %240, %242 : vector<8x32xf32>
    %246 = arith.addf %244, %245 : vector<8x32xf32>
    %247 = math.tanh %246 : vector<8x32xf32>
    %248 = arith.mulf %243, %247 : vector<8x32xf32>
    %249 = vector.extract_strided_slice %95 {offsets = [56, 0], sizes = [8, 128], strides = [1, 1]} : vector<64x128xf32> to vector<8x128xf32>
    %cst_120 = arith.constant dense<0.000000e+00> : vector<8x128xf32>
    %250 = tpu.matmul %248, %90, %cst_120 {dimension_numbers = #tpu.dot_dimension_numbers<[1], [0], [0], [1], [0, 0, 1, 1], [], []>} : vector<8x32xf32>, vector<32x128xf32>, vector<8x128xf32> -> vector<8x128xf32>
    %251 = arith.addf %249, %250 : vector<8x128xf32>
    %cst_121 = arith.constant 5.000000e-01 : f32
    %252 = vector.broadcast %cst_121 : f32 to vector<8x128xf32>
    %253 = arith.mulf %252, %251 : vector<8x128xf32>
    %254 = arith.select %88, %251, %253 : vector<8x128xi1>, vector<8x128xf32>
    %255 = math.tanh %254 : vector<8x128xf32>
    %cst_122 = arith.constant 5.000000e-01 : f32
    %256 = vector.broadcast %cst_122 : f32 to vector<8x128xf32>
    %257 = arith.mulf %256, %255 : vector<8x128xf32>
    %cst_123 = arith.constant 5.000000e-01 : f32
    %258 = vector.broadcast %cst_123 : f32 to vector<8x128xf32>
    %259 = arith.addf %257, %258 : vector<8x128xf32>
    %260 = arith.select %88, %255, %259 : vector<8x128xi1>, vector<8x128xf32>
    %261 = vector.extract_strided_slice %260 {offsets = [0, 0], sizes = [8, 32], strides = [1, 1]} : vector<8x128xf32> to vector<8x32xf32>
    %262 = vector.extract_strided_slice %260 {offsets = [0, 32], sizes = [8, 32], strides = [1, 1]} : vector<8x128xf32> to vector<8x32xf32>
    %263 = vector.extract_strided_slice %260 {offsets = [0, 64], sizes = [8, 32], strides = [1, 1]} : vector<8x128xf32> to vector<8x32xf32>
    %264 = vector.extract_strided_slice %260 {offsets = [0, 96], sizes = [8, 32], strides = [1, 1]} : vector<8x128xf32> to vector<8x32xf32>
    %265 = arith.mulf %262, %246 : vector<8x32xf32>
    %266 = arith.mulf %261, %263 : vector<8x32xf32>
    %267 = arith.addf %265, %266 : vector<8x32xf32>
    %268 = math.tanh %267 : vector<8x32xf32>
    %269 = arith.mulf %264, %268 : vector<8x32xf32>
    %270 = tpu.concatenate %122, %143, %164, %185, %206, %227, %248, %269 in 0 : vector<8x32xf32>, vector<8x32xf32>, vector<8x32xf32>, vector<8x32xf32>, vector<8x32xf32>, vector<8x32xf32>, vector<8x32xf32>, vector<8x32xf32> -> vector<64x32xf32>
    %c0_124 = arith.constant 0 : index
    %c0_125 = arith.constant 0 : index
    %271 = vector.load %arg8[%c0_124, %c0_125] : memref<32x128xf32, #tpu.memory_space<vmem>>, vector<32x128xf32>
    %c0_126 = arith.constant 0 : index
    %c0_127 = arith.constant 0 : index
    %272 = vector.load %arg7[%c0_126, %c0_127] : memref<32x128xf32, #tpu.memory_space<vmem>>, vector<32x128xf32>
    %cst_128 = arith.constant dense<0.000000e+00> : vector<64x128xf32>
    %273 = tpu.matmul %270, %272, %cst_128 {dimension_numbers = #tpu.dot_dimension_numbers<[1], [0], [0], [1], [0, 0, 1, 1], [], []>} : vector<64x32xf32>, vector<32x128xf32>, vector<64x128xf32> -> vector<64x128xf32>
    %c0_129 = arith.constant 0 : index
    %c0_130 = arith.constant 0 : index
    %274 = vector.load %arg9[%c0_129, %c0_130] : memref<1x128xf32, #tpu.memory_space<vmem>>, vector<1x128xf32>
    %275 = vector.broadcast %274 : vector<1x128xf32> to vector<64x128xf32>
    %276 = arith.addf %273, %275 : vector<64x128xf32>
    %c1_131 = arith.constant 1 : index
    %c0_132 = arith.constant 0 : index
    %c0_133 = arith.constant 0 : index
    %277 = vector.load %arg2[%c1_131, %c0_132, %c0_133] : memref<2x2x32xf32, #tpu.memory_space<vmem>>, vector<1x2x32xf32>
    %278 = vector.shape_cast %277 : vector<1x2x32xf32> to vector<2x32xf32>
    %279 = tpu.concatenate %278, %89 in 0 : vector<2x32xf32>, vector<6x32xf32> -> vector<8x32xf32>
    %c1_134 = arith.constant 1 : index
    %c0_135 = arith.constant 0 : index
    %c0_136 = arith.constant 0 : index
    %280 = vector.load %arg3[%c1_134, %c0_135, %c0_136] : memref<2x2x32xf32, #tpu.memory_space<vmem>>, vector<1x2x32xf32>
    %281 = vector.shape_cast %280 : vector<1x2x32xf32> to vector<2x32xf32>
    %282 = tpu.concatenate %281, %89 in 0 : vector<2x32xf32>, vector<6x32xf32> -> vector<8x32xf32>
    %283 = vector.extract_strided_slice %276 {offsets = [0, 0], sizes = [8, 128], strides = [1, 1]} : vector<64x128xf32> to vector<8x128xf32>
    %cst_137 = arith.constant dense<0.000000e+00> : vector<8x128xf32>
    %284 = tpu.matmul %279, %271, %cst_137 {dimension_numbers = #tpu.dot_dimension_numbers<[1], [0], [0], [1], [0, 0, 1, 1], [], []>} : vector<8x32xf32>, vector<32x128xf32>, vector<8x128xf32> -> vector<8x128xf32>
    %285 = arith.addf %283, %284 : vector<8x128xf32>
    %cst_138 = arith.constant 5.000000e-01 : f32
    %286 = vector.broadcast %cst_138 : f32 to vector<8x128xf32>
    %287 = arith.mulf %286, %285 : vector<8x128xf32>
    %288 = arith.select %88, %285, %287 : vector<8x128xi1>, vector<8x128xf32>
    %289 = math.tanh %288 : vector<8x128xf32>
    %cst_139 = arith.constant 5.000000e-01 : f32
    %290 = vector.broadcast %cst_139 : f32 to vector<8x128xf32>
    %291 = arith.mulf %290, %289 : vector<8x128xf32>
    %cst_140 = arith.constant 5.000000e-01 : f32
    %292 = vector.broadcast %cst_140 : f32 to vector<8x128xf32>
    %293 = arith.addf %291, %292 : vector<8x128xf32>
    %294 = arith.select %88, %289, %293 : vector<8x128xi1>, vector<8x128xf32>
    %295 = vector.extract_strided_slice %294 {offsets = [0, 0], sizes = [8, 32], strides = [1, 1]} : vector<8x128xf32> to vector<8x32xf32>
    %296 = vector.extract_strided_slice %294 {offsets = [0, 32], sizes = [8, 32], strides = [1, 1]} : vector<8x128xf32> to vector<8x32xf32>
    %297 = vector.extract_strided_slice %294 {offsets = [0, 64], sizes = [8, 32], strides = [1, 1]} : vector<8x128xf32> to vector<8x32xf32>
    %298 = vector.extract_strided_slice %294 {offsets = [0, 96], sizes = [8, 32], strides = [1, 1]} : vector<8x128xf32> to vector<8x32xf32>
    %299 = arith.mulf %296, %282 : vector<8x32xf32>
    %300 = arith.mulf %295, %297 : vector<8x32xf32>
    %301 = arith.addf %299, %300 : vector<8x32xf32>
    %302 = math.tanh %301 : vector<8x32xf32>
    %303 = arith.mulf %298, %302 : vector<8x32xf32>
    %304 = vector.extract_strided_slice %276 {offsets = [8, 0], sizes = [8, 128], strides = [1, 1]} : vector<64x128xf32> to vector<8x128xf32>
    %cst_141 = arith.constant dense<0.000000e+00> : vector<8x128xf32>
    %305 = tpu.matmul %303, %271, %cst_141 {dimension_numbers = #tpu.dot_dimension_numbers<[1], [0], [0], [1], [0, 0, 1, 1], [], []>} : vector<8x32xf32>, vector<32x128xf32>, vector<8x128xf32> -> vector<8x128xf32>
    %306 = arith.addf %304, %305 : vector<8x128xf32>
    %cst_142 = arith.constant 5.000000e-01 : f32
    %307 = vector.broadcast %cst_142 : f32 to vector<8x128xf32>
    %308 = arith.mulf %307, %306 : vector<8x128xf32>
    %309 = arith.select %88, %306, %308 : vector<8x128xi1>, vector<8x128xf32>
    %310 = math.tanh %309 : vector<8x128xf32>
    %cst_143 = arith.constant 5.000000e-01 : f32
    %311 = vector.broadcast %cst_143 : f32 to vector<8x128xf32>
    %312 = arith.mulf %311, %310 : vector<8x128xf32>
    %cst_144 = arith.constant 5.000000e-01 : f32
    %313 = vector.broadcast %cst_144 : f32 to vector<8x128xf32>
    %314 = arith.addf %312, %313 : vector<8x128xf32>
    %315 = arith.select %88, %310, %314 : vector<8x128xi1>, vector<8x128xf32>
    %316 = vector.extract_strided_slice %315 {offsets = [0, 0], sizes = [8, 32], strides = [1, 1]} : vector<8x128xf32> to vector<8x32xf32>
    %317 = vector.extract_strided_slice %315 {offsets = [0, 32], sizes = [8, 32], strides = [1, 1]} : vector<8x128xf32> to vector<8x32xf32>
    %318 = vector.extract_strided_slice %315 {offsets = [0, 64], sizes = [8, 32], strides = [1, 1]} : vector<8x128xf32> to vector<8x32xf32>
    %319 = vector.extract_strided_slice %315 {offsets = [0, 96], sizes = [8, 32], strides = [1, 1]} : vector<8x128xf32> to vector<8x32xf32>
    %320 = arith.mulf %317, %301 : vector<8x32xf32>
    %321 = arith.mulf %316, %318 : vector<8x32xf32>
    %322 = arith.addf %320, %321 : vector<8x32xf32>
    %323 = math.tanh %322 : vector<8x32xf32>
    %324 = arith.mulf %319, %323 : vector<8x32xf32>
    %325 = vector.extract_strided_slice %276 {offsets = [16, 0], sizes = [8, 128], strides = [1, 1]} : vector<64x128xf32> to vector<8x128xf32>
    %cst_145 = arith.constant dense<0.000000e+00> : vector<8x128xf32>
    %326 = tpu.matmul %324, %271, %cst_145 {dimension_numbers = #tpu.dot_dimension_numbers<[1], [0], [0], [1], [0, 0, 1, 1], [], []>} : vector<8x32xf32>, vector<32x128xf32>, vector<8x128xf32> -> vector<8x128xf32>
    %327 = arith.addf %325, %326 : vector<8x128xf32>
    %cst_146 = arith.constant 5.000000e-01 : f32
    %328 = vector.broadcast %cst_146 : f32 to vector<8x128xf32>
    %329 = arith.mulf %328, %327 : vector<8x128xf32>
    %330 = arith.select %88, %327, %329 : vector<8x128xi1>, vector<8x128xf32>
    %331 = math.tanh %330 : vector<8x128xf32>
    %cst_147 = arith.constant 5.000000e-01 : f32
    %332 = vector.broadcast %cst_147 : f32 to vector<8x128xf32>
    %333 = arith.mulf %332, %331 : vector<8x128xf32>
    %cst_148 = arith.constant 5.000000e-01 : f32
    %334 = vector.broadcast %cst_148 : f32 to vector<8x128xf32>
    %335 = arith.addf %333, %334 : vector<8x128xf32>
    %336 = arith.select %88, %331, %335 : vector<8x128xi1>, vector<8x128xf32>
    %337 = vector.extract_strided_slice %336 {offsets = [0, 0], sizes = [8, 32], strides = [1, 1]} : vector<8x128xf32> to vector<8x32xf32>
    %338 = vector.extract_strided_slice %336 {offsets = [0, 32], sizes = [8, 32], strides = [1, 1]} : vector<8x128xf32> to vector<8x32xf32>
    %339 = vector.extract_strided_slice %336 {offsets = [0, 64], sizes = [8, 32], strides = [1, 1]} : vector<8x128xf32> to vector<8x32xf32>
    %340 = vector.extract_strided_slice %336 {offsets = [0, 96], sizes = [8, 32], strides = [1, 1]} : vector<8x128xf32> to vector<8x32xf32>
    %341 = arith.mulf %338, %322 : vector<8x32xf32>
    %342 = arith.mulf %337, %339 : vector<8x32xf32>
    %343 = arith.addf %341, %342 : vector<8x32xf32>
    %344 = math.tanh %343 : vector<8x32xf32>
    %345 = arith.mulf %340, %344 : vector<8x32xf32>
    %346 = vector.extract_strided_slice %276 {offsets = [24, 0], sizes = [8, 128], strides = [1, 1]} : vector<64x128xf32> to vector<8x128xf32>
    %cst_149 = arith.constant dense<0.000000e+00> : vector<8x128xf32>
    %347 = tpu.matmul %345, %271, %cst_149 {dimension_numbers = #tpu.dot_dimension_numbers<[1], [0], [0], [1], [0, 0, 1, 1], [], []>} : vector<8x32xf32>, vector<32x128xf32>, vector<8x128xf32> -> vector<8x128xf32>
    %348 = arith.addf %346, %347 : vector<8x128xf32>
    %cst_150 = arith.constant 5.000000e-01 : f32
    %349 = vector.broadcast %cst_150 : f32 to vector<8x128xf32>
    %350 = arith.mulf %349, %348 : vector<8x128xf32>
    %351 = arith.select %88, %348, %350 : vector<8x128xi1>, vector<8x128xf32>
    %352 = math.tanh %351 : vector<8x128xf32>
    %cst_151 = arith.constant 5.000000e-01 : f32
    %353 = vector.broadcast %cst_151 : f32 to vector<8x128xf32>
    %354 = arith.mulf %353, %352 : vector<8x128xf32>
    %cst_152 = arith.constant 5.000000e-01 : f32
    %355 = vector.broadcast %cst_152 : f32 to vector<8x128xf32>
    %356 = arith.addf %354, %355 : vector<8x128xf32>
    %357 = arith.select %88, %352, %356 : vector<8x128xi1>, vector<8x128xf32>
    %358 = vector.extract_strided_slice %357 {offsets = [0, 0], sizes = [8, 32], strides = [1, 1]} : vector<8x128xf32> to vector<8x32xf32>
    %359 = vector.extract_strided_slice %357 {offsets = [0, 32], sizes = [8, 32], strides = [1, 1]} : vector<8x128xf32> to vector<8x32xf32>
    %360 = vector.extract_strided_slice %357 {offsets = [0, 64], sizes = [8, 32], strides = [1, 1]} : vector<8x128xf32> to vector<8x32xf32>
    %361 = vector.extract_strided_slice %357 {offsets = [0, 96], sizes = [8, 32], strides = [1, 1]} : vector<8x128xf32> to vector<8x32xf32>
    %362 = arith.mulf %359, %343 : vector<8x32xf32>
    %363 = arith.mulf %358, %360 : vector<8x32xf32>
    %364 = arith.addf %362, %363 : vector<8x32xf32>
    %365 = math.tanh %364 : vector<8x32xf32>
    %366 = arith.mulf %361, %365 : vector<8x32xf32>
    %367 = vector.extract_strided_slice %276 {offsets = [32, 0], sizes = [8, 128], strides = [1, 1]} : vector<64x128xf32> to vector<8x128xf32>
    %cst_153 = arith.constant dense<0.000000e+00> : vector<8x128xf32>
    %368 = tpu.matmul %366, %271, %cst_153 {dimension_numbers = #tpu.dot_dimension_numbers<[1], [0], [0], [1], [0, 0, 1, 1], [], []>} : vector<8x32xf32>, vector<32x128xf32>, vector<8x128xf32> -> vector<8x128xf32>
    %369 = arith.addf %367, %368 : vector<8x128xf32>
    %cst_154 = arith.constant 5.000000e-01 : f32
    %370 = vector.broadcast %cst_154 : f32 to vector<8x128xf32>
    %371 = arith.mulf %370, %369 : vector<8x128xf32>
    %372 = arith.select %88, %369, %371 : vector<8x128xi1>, vector<8x128xf32>
    %373 = math.tanh %372 : vector<8x128xf32>
    %cst_155 = arith.constant 5.000000e-01 : f32
    %374 = vector.broadcast %cst_155 : f32 to vector<8x128xf32>
    %375 = arith.mulf %374, %373 : vector<8x128xf32>
    %cst_156 = arith.constant 5.000000e-01 : f32
    %376 = vector.broadcast %cst_156 : f32 to vector<8x128xf32>
    %377 = arith.addf %375, %376 : vector<8x128xf32>
    %378 = arith.select %88, %373, %377 : vector<8x128xi1>, vector<8x128xf32>
    %379 = vector.extract_strided_slice %378 {offsets = [0, 0], sizes = [8, 32], strides = [1, 1]} : vector<8x128xf32> to vector<8x32xf32>
    %380 = vector.extract_strided_slice %378 {offsets = [0, 32], sizes = [8, 32], strides = [1, 1]} : vector<8x128xf32> to vector<8x32xf32>
    %381 = vector.extract_strided_slice %378 {offsets = [0, 64], sizes = [8, 32], strides = [1, 1]} : vector<8x128xf32> to vector<8x32xf32>
    %382 = vector.extract_strided_slice %378 {offsets = [0, 96], sizes = [8, 32], strides = [1, 1]} : vector<8x128xf32> to vector<8x32xf32>
    %383 = arith.mulf %380, %364 : vector<8x32xf32>
    %384 = arith.mulf %379, %381 : vector<8x32xf32>
    %385 = arith.addf %383, %384 : vector<8x32xf32>
    %386 = math.tanh %385 : vector<8x32xf32>
    %387 = arith.mulf %382, %386 : vector<8x32xf32>
    %388 = vector.extract_strided_slice %276 {offsets = [40, 0], sizes = [8, 128], strides = [1, 1]} : vector<64x128xf32> to vector<8x128xf32>
    %cst_157 = arith.constant dense<0.000000e+00> : vector<8x128xf32>
    %389 = tpu.matmul %387, %271, %cst_157 {dimension_numbers = #tpu.dot_dimension_numbers<[1], [0], [0], [1], [0, 0, 1, 1], [], []>} : vector<8x32xf32>, vector<32x128xf32>, vector<8x128xf32> -> vector<8x128xf32>
    %390 = arith.addf %388, %389 : vector<8x128xf32>
    %cst_158 = arith.constant 5.000000e-01 : f32
    %391 = vector.broadcast %cst_158 : f32 to vector<8x128xf32>
    %392 = arith.mulf %391, %390 : vector<8x128xf32>
    %393 = arith.select %88, %390, %392 : vector<8x128xi1>, vector<8x128xf32>
    %394 = math.tanh %393 : vector<8x128xf32>
    %cst_159 = arith.constant 5.000000e-01 : f32
    %395 = vector.broadcast %cst_159 : f32 to vector<8x128xf32>
    %396 = arith.mulf %395, %394 : vector<8x128xf32>
    %cst_160 = arith.constant 5.000000e-01 : f32
    %397 = vector.broadcast %cst_160 : f32 to vector<8x128xf32>
    %398 = arith.addf %396, %397 : vector<8x128xf32>
    %399 = arith.select %88, %394, %398 : vector<8x128xi1>, vector<8x128xf32>
    %400 = vector.extract_strided_slice %399 {offsets = [0, 0], sizes = [8, 32], strides = [1, 1]} : vector<8x128xf32> to vector<8x32xf32>
    %401 = vector.extract_strided_slice %399 {offsets = [0, 32], sizes = [8, 32], strides = [1, 1]} : vector<8x128xf32> to vector<8x32xf32>
    %402 = vector.extract_strided_slice %399 {offsets = [0, 64], sizes = [8, 32], strides = [1, 1]} : vector<8x128xf32> to vector<8x32xf32>
    %403 = vector.extract_strided_slice %399 {offsets = [0, 96], sizes = [8, 32], strides = [1, 1]} : vector<8x128xf32> to vector<8x32xf32>
    %404 = arith.mulf %401, %385 : vector<8x32xf32>
    %405 = arith.mulf %400, %402 : vector<8x32xf32>
    %406 = arith.addf %404, %405 : vector<8x32xf32>
    %407 = math.tanh %406 : vector<8x32xf32>
    %408 = arith.mulf %403, %407 : vector<8x32xf32>
    %409 = vector.extract_strided_slice %276 {offsets = [48, 0], sizes = [8, 128], strides = [1, 1]} : vector<64x128xf32> to vector<8x128xf32>
    %cst_161 = arith.constant dense<0.000000e+00> : vector<8x128xf32>
    %410 = tpu.matmul %408, %271, %cst_161 {dimension_numbers = #tpu.dot_dimension_numbers<[1], [0], [0], [1], [0, 0, 1, 1], [], []>} : vector<8x32xf32>, vector<32x128xf32>, vector<8x128xf32> -> vector<8x128xf32>
    %411 = arith.addf %409, %410 : vector<8x128xf32>
    %cst_162 = arith.constant 5.000000e-01 : f32
    %412 = vector.broadcast %cst_162 : f32 to vector<8x128xf32>
    %413 = arith.mulf %412, %411 : vector<8x128xf32>
    %414 = arith.select %88, %411, %413 : vector<8x128xi1>, vector<8x128xf32>
    %415 = math.tanh %414 : vector<8x128xf32>
    %cst_163 = arith.constant 5.000000e-01 : f32
    %416 = vector.broadcast %cst_163 : f32 to vector<8x128xf32>
    %417 = arith.mulf %416, %415 : vector<8x128xf32>
    %cst_164 = arith.constant 5.000000e-01 : f32
    %418 = vector.broadcast %cst_164 : f32 to vector<8x128xf32>
    %419 = arith.addf %417, %418 : vector<8x128xf32>
    %420 = arith.select %88, %415, %419 : vector<8x128xi1>, vector<8x128xf32>
    %421 = vector.extract_strided_slice %420 {offsets = [0, 0], sizes = [8, 32], strides = [1, 1]} : vector<8x128xf32> to vector<8x32xf32>
    %422 = vector.extract_strided_slice %420 {offsets = [0, 32], sizes = [8, 32], strides = [1, 1]} : vector<8x128xf32> to vector<8x32xf32>
    %423 = vector.extract_strided_slice %420 {offsets = [0, 64], sizes = [8, 32], strides = [1, 1]} : vector<8x128xf32> to vector<8x32xf32>
    %424 = vector.extract_strided_slice %420 {offsets = [0, 96], sizes = [8, 32], strides = [1, 1]} : vector<8x128xf32> to vector<8x32xf32>
    %425 = arith.mulf %422, %406 : vector<8x32xf32>
    %426 = arith.mulf %421, %423 : vector<8x32xf32>
    %427 = arith.addf %425, %426 : vector<8x32xf32>
    %428 = math.tanh %427 : vector<8x32xf32>
    %429 = arith.mulf %424, %428 : vector<8x32xf32>
    %430 = vector.extract_strided_slice %276 {offsets = [56, 0], sizes = [8, 128], strides = [1, 1]} : vector<64x128xf32> to vector<8x128xf32>
    %cst_165 = arith.constant dense<0.000000e+00> : vector<8x128xf32>
    %431 = tpu.matmul %429, %271, %cst_165 {dimension_numbers = #tpu.dot_dimension_numbers<[1], [0], [0], [1], [0, 0, 1, 1], [], []>} : vector<8x32xf32>, vector<32x128xf32>, vector<8x128xf32> -> vector<8x128xf32>
    %432 = arith.addf %430, %431 : vector<8x128xf32>
    %cst_166 = arith.constant 5.000000e-01 : f32
    %433 = vector.broadcast %cst_166 : f32 to vector<8x128xf32>
    %434 = arith.mulf %433, %432 : vector<8x128xf32>
    %435 = arith.select %88, %432, %434 : vector<8x128xi1>, vector<8x128xf32>
    %436 = math.tanh %435 : vector<8x128xf32>
    %cst_167 = arith.constant 5.000000e-01 : f32
    %437 = vector.broadcast %cst_167 : f32 to vector<8x128xf32>
    %438 = arith.mulf %437, %436 : vector<8x128xf32>
    %cst_168 = arith.constant 5.000000e-01 : f32
    %439 = vector.broadcast %cst_168 : f32 to vector<8x128xf32>
    %440 = arith.addf %438, %439 : vector<8x128xf32>
    %441 = arith.select %88, %436, %440 : vector<8x128xi1>, vector<8x128xf32>
    %442 = vector.extract_strided_slice %441 {offsets = [0, 0], sizes = [8, 32], strides = [1, 1]} : vector<8x128xf32> to vector<8x32xf32>
    %443 = vector.extract_strided_slice %441 {offsets = [0, 32], sizes = [8, 32], strides = [1, 1]} : vector<8x128xf32> to vector<8x32xf32>
    %444 = vector.extract_strided_slice %441 {offsets = [0, 64], sizes = [8, 32], strides = [1, 1]} : vector<8x128xf32> to vector<8x32xf32>
    %445 = vector.extract_strided_slice %441 {offsets = [0, 96], sizes = [8, 32], strides = [1, 1]} : vector<8x128xf32> to vector<8x32xf32>
    %446 = arith.mulf %443, %427 : vector<8x32xf32>
    %447 = arith.mulf %442, %444 : vector<8x32xf32>
    %448 = arith.addf %446, %447 : vector<8x32xf32>
    %449 = math.tanh %448 : vector<8x32xf32>
    %450 = arith.mulf %445, %449 : vector<8x32xf32>
    %c0_169 = arith.constant 0 : index
    %c0_170 = arith.constant 0 : index
    %451 = vector.load %arg10[%c0_169, %c0_170] : memref<1x32xf32, #tpu.memory_space<vmem>>, vector<1x32xf32>
    %452 = vector.broadcast %451 : vector<1x32xf32> to vector<8x32xf32>
    %453 = arith.mulf %450, %452 : vector<8x32xf32>
    %cst_171 = arith.constant dense<0.000000e+00> : vector<8xf32>
    %454 = vector.multi_reduction <add>, %453, %cst_171 [1] : vector<8x32xf32> to vector<8xf32>
    %455 = vector.shape_cast %454 : vector<8xf32> to vector<8x1xf32>
    %c0_172 = arith.constant 0 : index
    %c0_173 = arith.constant 0 : index
    %456 = vector.load %arg11[%c0_172, %c0_173] : memref<1x1xf32, #tpu.memory_space<vmem>>, vector<1x1xf32>
    %457 = vector.broadcast %456 : vector<1x1xf32> to vector<8x1xf32>
    %458 = arith.addf %455, %457 : vector<8x1xf32>
    %cst_174 = arith.constant 5.000000e-01 : f32
    %459 = vector.broadcast %cst_174 : f32 to vector<8x1xf32>
    %460 = arith.mulf %459, %458 : vector<8x1xf32>
    %461 = math.tanh %460 : vector<8x1xf32>
    %cst_175 = arith.constant 5.000000e-01 : f32
    %462 = vector.broadcast %cst_175 : f32 to vector<8x1xf32>
    %463 = arith.mulf %462, %461 : vector<8x1xf32>
    %cst_176 = arith.constant 5.000000e-01 : f32
    %464 = vector.broadcast %cst_176 : f32 to vector<8x1xf32>
    %465 = arith.addf %463, %464 : vector<8x1xf32>
    %cst_177 = arith.constant 0.000000e+00 : f32
    %466 = vector.broadcast %cst_177 : f32 to vector<8x127xf32>
    %467 = tpu.concatenate %269, %450, %267, %448, %465, %466 in 1 : vector<8x32xf32>, vector<8x32xf32>, vector<8x32xf32>, vector<8x32xf32>, vector<8x1xf32>, vector<8x127xf32> -> vector<8x256xf32>
    %c0_178 = arith.constant 0 : index
    %c0_179 = arith.constant 0 : index
    %468 = vector.load %arg12[%c0_178, %c0_179] : memref<8x256xf32, #tpu.memory_space<vmem>>, vector<8x256xf32>
    tpu.vector_store %arg12[%c0_178, %c0_179], %467 {strides = array<i32>} : memref<8x256xf32, #tpu.memory_space<vmem>>, vector<8x256xf32>,
    return
  }
}

</mosaic_0001>

<bundles_post_ra>
// kernel: mbti_rnn_forward.1
= control target key start
LH: loop header
LB: loop body
LE: loop exit
PB: predicated region body
PF: predicated region fallthrough
CT: control target
= control target key end

     0   :  { %s1869_s0 = inlined_call_operand.vmem [shape: s32[2,8], index: 0, kind: input, shape index: {}]   ;;  %s1870_s1 = inlined_call_operand.vmem [shape: f32[50,1,32], index: 1, kind: input, shape index: {}]   ;;  %s1871_s2 = inlined_call_operand.vmem [shape: f32[2,2,32], index: 2, kind: input, shape index: {}]   ;;  %s1872_s3 = inlined_call_operand.vmem [shape: f32[2,2,32], index: 3, kind: input, shape index: {}]   ;;  %s1873_s4 = inlined_call_operand.vmem [shape: f32[32,128], index: 4, kind: input, shape index: {}]   ;;  %s1874_s5 = inlined_call_operand.vmem [shape: f32[32,128], index: 5, kind: input, shape index: {}]   ;;  %s1875_s6 = inlined_call_operand.vmem [shape: f32[1,128], index: 6, kind: input, shape index: {}]   ;;  %s1876_s7 = inlined_call_operand.hbm [shape: f32[32,128], index: 7, kind: input, shape index: {}]   ;;  %s1877_s8 = inlined_call_operand.hbm [shape: f32[32,128], index: 8, kind: input, shape index: {}]   ;;  %s1878_s9 = inlined_call_operand.vmem [shape: f32[1,128], index: 9, kind: input, shape index: {}]   ;;  %s1879_s10 = inlined_call_operand.vmem [shape: f32[1,32], index: 10, kind: input, shape index: {}]   ;;  %s1880_s11 = inlined_call_operand.<no memory space> [shape: f32[1,1], index: 11, kind: input, shape index: {}]   ;;  %s1881_s12 = inlined_call_operand.vmem [shape: f32[8,256], index: 12, kind: output, shape index: {}]  }
   0x1   :  { %v17_v0 = vstv %s1880_s11 }
   0x2   :  { %18 = vst [vmem:[#allocation3] sm:$0x1] %v17_v0 }
   0x3   :  { %19 = vsyncpa [#allocation6], 0 }
   0x4   :  { %20 = vsyncpa [#allocation5], 0  ;;  %s27_s25 = sshll.u32 %s1869_s0, 4  ;;  %s28_s25 = int_to_ptr.vmem [resolvable:$true] %s27_s25 }
   0x5   :  { %21 = vsyncpa [#allocation9], 0  ;;  %s47_s28 = sshll.u32 %s1876_s7, 4  ;;  %s1371_s29 = smov [#allocation4]   ;;  %s48_s28 = int_to_ptr.hbm [resolvable:$true] %s47_s28 }
   0x6   :  { %30 = dma.vmem_to_smem %s28_s25, 32, %s1371_s29, [#allocation6]  }
   0x7   :  { %s1372_s30 = smov [#allocation7]   ;;  %s1373_s11 = smov 128  }
   0x8   :  { %s49_s13 = sshll.u32 %s1372_s30, 4  ;;  %s1374_s14 = smov 8   ;;  %s50_s13 = int_to_ptr.vmem [resolvable:$true] %s49_s13 }
   0x9   :  { %55 = dma.hbm_to_vmem [thread:$0]  %s48_s28, 512, %s50_s13, [#allocation5], %s1373_s11, %s1373_s11, %s1374_s14  }
   0xa   :  { %s60_s17 = sshll.u32 %s1877_s8, 4  ;;  %s1375_s0 = smov [#allocation8]   ;;  %s61_s17 = int_to_ptr.hbm [resolvable:$true] %s60_s17 }
   0xb   :  { %s62_s18 = sshll.u32 %s1375_s0, 4  ;;  %s63_s18 = int_to_ptr.vmem [resolvable:$true] %s62_s18 }
   0xc   :  { %68 = dma.hbm_to_vmem [thread:$0]  %s61_s17, 512, %s63_s18, [#allocation9], %s1373_s11, %s1373_s11, %s1374_s14  }
   0xd   :  { %1365 = dma.done.wait [#allocation6], 32  }
   0xe   :  { %1366 = vsyncadd [#allocation6], 4294967264 }
   0xf   :  { %1367 = dma.done.wait [#allocation5], 512  }
  0x10   :  { %1368 = vsyncadd [#allocation5], 4294966784 }
  0x11   :  { %1369 = dma.done.wait [#allocation9], 512  }
  0x12   :  { %1370 = vsyncadd [#allocation9], 4294966784 }
  0x13   :  { %87 = sfence }
  0x14   :  { %v182_v1 = vld [vmem:[%s1873_s4 + $0x18] sm:$0xff]  ;;  %v181_v2 = vld [vmem:[%s1873_s4 + $0x10] sm:$0xff]  ;;  %vm88_vm0 = vcmask 261120   ;;  %v1376_v5 = vmov 0.0   ;;  %s97_s25 = sld [smem:[#allocation4]]  ;;  %v180_v6 = vld [vmem:[%s1873_s4 + $0x8] sm:$0xff]  ;;  %v170_v15 = vlaneseq }
  0x15   :  { %v1466_v3 = vld [vmem:[%s1874_s5 + $0x18] sm:$0xff]  ;;  %223 = vmatpush.msra.mxu0 %v182_v1  ;;  %v1472_v4 = vld [vmem:[%s1874_s5 + $0x10] sm:$0xff]  ;;  %89 = vst.msk [vmem:[#allocation2] sm:$0xff] %vm88_vm0, %v1376_v5  ;;  %v1481_v7 = vld [vmem:[%s1874_s5 + $0x8] sm:$0xff]  ;;  %s1483_s30 = sld [smem:[#allocation4 + $0x80]]  ;;  %vm253_vm1 = vcmask 1041408  }
  0x16   :  { %272 = vmatpush.msra.mxu1 %v1466_v3  ;;  %90 = vst.msk [vmem:[#allocation2 + $0x8] sm:$0xff] %vm88_vm0, %v1376_v5  ;;  %325 = vmatpush.msra.mxu2 %v1466_v3  ;;  %v252_v8 = vld [vmem:[%s1871_s2] sm:$0x3]  ;;  %vm100_vm2 = vcmask 253952   ;;  %v171_v17 = vand.u32 127, %v170_v15  ;;  %s1378_s23 = smov 32  }
  0x17   :  { %224 = vmatpush.msra.mxu0 %v181_v2  ;;  %91 = vst.msk [vmem:[#allocation2 + $0x10] sm:$0xff] %vm88_vm0, %v1376_v5  ;;  %v179_v9 = vld [vmem:[%s1873_s4] sm:$0xff]  ;;  %v254_v11 = vsel %vm253_vm1, %v252_v8, 0.0  ;;  %v657_v39 = vld [vmem:[#allocation7 + $0x10] sm:$0xff]  ;;  %v656_v40 = vld [vmem:[#allocation7 + $0x8] sm:$0xff]  ;;  %s1178_s24 = sld [smem:[#allocation4 + $0x1]] }
  0x18   :  { %273 = vmatpush.msra.mxu1 %v1472_v4  ;;  %92 = vst.msk [vmem:[#allocation2 + $0x18] sm:$0xff] %vm88_vm0, %v1376_v5  ;;  %v1499_v10 = vld [vmem:[%s1874_s5] sm:$0xff]  ;;  %326 = vmatpush.msra.mxu2 %v1472_v4  ;;  %vm172_vm3 = vcmp.ge.s32.totalorder %v171_v17, 64  ;;  %vm173_vm4 = vcmp.lt.s32.totalorder %v171_v17, 96  ;;  %s1180_s11 = sld [smem:[#allocation4 + $0x2]]  ;;  %s1379_s0 = smov 96  }
  0x19   :  { %225 = vmatpush.msra.mxu0 %v180_v6  ;;  %93 = vst.msk [vmem:[#allocation2 + $0x20] sm:$0xff] %vm88_vm0, %v1376_v5  ;;  %v1537_v16 = vld [vmem:[%s1875_s6] ss:$0 sm:$0xff]  ;;  %vm1540_vm5 = vmand %vm172_vm3, %vm173_vm4  ;;  %s1377_s6 = smov 64   ;;  %v655_v41 = vld [vmem:[#allocation7] sm:$0xff]  ;;  %s1181_s14 = sld [smem:[#allocation4 + $0x82]] }
  0x1a   :  { %274 = vmatpush.msra.mxu1 %v1481_v7  ;;  %94 = vst.msk [vmem:[#allocation2 + $0x28] sm:$0xff] %vm88_vm0, %v1376_v5  ;;  %327 = vmatpush.msra.mxu2 %v1481_v7  ;;  %s98_s5 = scalar_lea.vmem %s1870_s1, %s97_s25  ;;  %v255_v29 = vld [vmem:[%s1872_s3] sm:$0x3]  ;;  %s1179_s25 = sld [smem:[#allocation4 + $0x81]]  ;;  %vm1146_vm6 = vcmask 523264   ;;  %vm1148_vm7 = vcmask 785408  }
  0x1b   :  { %226 = vmatpush.msra.mxu0 %v179_v9  ;;  %95 = vst.msk [vmem:[#allocation2 + $0x30] sm:$0xff] %vm88_vm0, %v1376_v5  ;;  %v99_v12 = vld [vmem:[%s98_s5] sm:$0x1]  ;;  %s103_s19 = scalar_lea.vmem %s1870_s1, %s1483_s30  ;;  %v256_v30 = vsel %vm253_vm1, %v255_v29, 0.0  ;;  %s1182_s18 = sld [smem:[#allocation4 + $0x3]]  ;;  %vm1150_vm8 = vcmask 7168  }
  0x1c   :  { %275 = vmatpush.msra.mxu1 %v1499_v10  ;;  %96 = vst.msk [vmem:[#allocation2 + $0x38] sm:$0xff] %vm88_vm0, %v1376_v5  ;;  %328 = vmatpush.msra.mxu2 %v1499_v10  ;;  %v104_v13 = vld [vmem:[%s103_s19] sm:$0x1]  ;;  %s1183_s7 = sld [smem:[#allocation4 + $0x83]] }
  0x1d   :  { %1200 = vmatmul.msk.f32.vlgmr.msra.gmra.mxu1 %vm88_vm0, %v254_v11  ;;  %101 = vst.msk [vmem:[#allocation2] sm:$0x1] %vm100_vm2, %v99_v12  ;;  %v658_v38 = vld [vmem:[#allocation7 + $0x18] sm:$0xff]  ;;  %s107_s28 = scalar_lea.vmem %s1870_s1, %s1178_s24  ;;  %s1185_s26 = sld [smem:[#allocation4 + $0x84]] }
  0x1e   :  { %374 = vmatpush.msrb.mxu1 %v1466_v3  ;;  %472 = vmatpush.msrb.mxu2 %v1466_v3  ;;  %105 = vst.msk [vmem:[#allocation2 + $0x1] sm:$0x1] %vm100_vm2, %v104_v13  ;;  %v108_v44 = vld [vmem:[%s107_s28] sm:$0x1]  ;;  %s115_s17 = scalar_lea.vmem %s1870_s1, %s1180_s11  ;;  %s1187_s15 = sld [smem:[#allocation4 + $0x85]] }
  0x1f   :  { %680 = vmatpush.msra.mxu3 %v658_v38  ;;  %109 = vst.msk [vmem:[#allocation2 + $0x8] sm:$0x1] %vm100_vm2, %v108_v44  ;;  %s119_s5 = scalar_lea.vmem %s1870_s1, %s1181_s14  ;;  %v116_v0 = vld [vmem:[%s115_s17] sm:$0x1]  ;;  %s1186_s14 = sld [smem:[#allocation4 + $0x5]] }
  0x20   :  { %375 = vmatpush.msrb.mxu1 %v1472_v4  ;;  %473 = vmatpush.msrb.mxu2 %v1472_v4  ;;  %s111_s13 = scalar_lea.vmem %s1870_s1, %s1179_s25  ;;  %v120_v1 = vld [vmem:[%s119_s5] sm:$0x1]  ;;  %117 = vst.msk [vmem:[#allocation2 + $0x10] sm:$0x1] %vm100_vm2, %v116_v0  ;;  %s1184_s25 = sld [smem:[#allocation4 + $0x4]] }
  0x21   :  { %681 = vmatpush.msra.mxu3 %v657_v39  ;;  %v112_v45 = vld [vmem:[%s111_s13] sm:$0x1]  ;;  %121 = vst.msk [vmem:[#allocation2 + $0x11] sm:$0x1] %vm100_vm2, %v120_v1  ;;  %s123_s21 = scalar_lea.vmem %s1870_s1, %s1182_s18  ;;  %s1189_s19 = sld [smem:[#allocation4 + $0x86]] }
  0x22   :  { %376 = vmatpush.msrb.mxu1 %v1481_v7  ;;  %474 = vmatpush.msrb.mxu2 %v1481_v7  ;;  %113 = vst.msk [vmem:[#allocation2 + $0x9] sm:$0x1] %vm100_vm2, %v112_v45  ;;  %s127_s24 = scalar_lea.vmem %s1870_s1, %s1183_s7  ;;  %s1188_s7 = sld [smem:[#allocation4 + $0x6]] }
  0x23   :  { %682 = vmatpush.msra.mxu3 %v656_v40  ;;  %v128_v29 = vld [vmem:[%s127_s24] sm:$0x1]  ;;  %s135_s11 = scalar_lea.vmem %s1870_s1, %s1185_s26  ;;  %s1191_s30 = sld [smem:[#allocation4 + $0x87]] }
  0x24   :  { %377 = vmatpush.msrb.mxu1 %v1499_v10  ;;  %475 = vmatpush.msrb.mxu2 %v1499_v10  ;;  %129 = vst.msk [vmem:[#allocation2 + $0x19] sm:$0x1] %vm100_vm2, %v128_v29  ;;  %s143_s18 = scalar_lea.vmem %s1870_s1, %s1187_s15 }
  0x25   :  { %v162_v14 = vld [vmem:[#allocation2] sm:$0xff]  ;;  %683 = vmatpush.msra.mxu3 %v655_v41  ;;  %s139_s4 = scalar_lea.vmem %s1870_s1, %s1186_s14 }
  0x26   :  { %423 = vmatpush.msra.mxu1 %v1466_v3  ;;  %1192 = vmatmul.msk.f32.vlgmr.msra.gmra.mxu0 %vm88_vm0, %v162_v14  ;;  %s131_s29 = scalar_lea.vmem %s1870_s1, %s1184_s25 }
  0x27   :  { %s151_s25 = scalar_lea.vmem %s1870_s1, %s1189_s19 }
  0x28   :  { %424 = vmatpush.msra.mxu1 %v1472_v4  ;;  %v164_v2 = vld [vmem:[#allocation2 + $0x10] sm:$0xff]  ;;  %s147_s8 = scalar_lea.vmem %s1870_s1, %s1188_s7 }
  0x29   :  { %v163_v46 = vld [vmem:[#allocation2 + $0x8] sm:$0xff]  ;;  %s159_s17 = scalar_lea.vmem %s1870_s1, %s1191_s30 }
  0x2a   :  { %425 = vmatpush.msra.mxu1 %v1481_v7 }
  0x2c   :  { %426 = vmatpush.msra.mxu1 %v1499_v10 }
  0x2e   :  { %1193 = vmatmul.msk.f32.gmra.mxu0 %vm88_vm0, %v163_v46 }
  0x36   :  { %1194 = vmatmul.msk.f32.gmra.mxu0 %vm88_vm0, %v164_v2 }
  0x9a   :  { %v277_v19 = vpop.f32.mrf.mxu1 }
  0xa3   :  { %v228_v18 = vpop.f32.mrf.mxu0 }
  0xa4   :  { %v229_v20 = vadd.f32 %v1537_v16, %v228_v18 }
  0xa6   :  { %v280_v21 = vadd.f32 %v277_v19, %v229_v20 }
  0xa8   :  { %v281_v23 = vmul.f32 0.5, %v280_v21 }
  0xaa   :  { %v282_v24 = vsel %vm1540_vm5, %v280_v21, %v281_v23 }
  0xab   :  { %1239 = vtanh.f32 %v282_v24  ;;  %v231_v48 = vpop.f32.mrf.mxu0 }
  0xac   :  { %v232_v49 = vadd.f32 %v1537_v16, %v231_v48 }
  0xb1   :  { %v1240_v25 = vpop.eup %1239 }
  0xb2   :  { %v284_v26 = vmul.f32 0.5, %v1240_v25 }
  0xb3   :  { %v234_v9 = vpop.f32.mrf.mxu0 }
  0xb4   :  { %v285_v27 = vadd.f32 0.5, %v284_v26  ;;  %v235_v11 = vadd.f32 %v1537_v16, %v234_v9  ;;  %v140_v9 = vld [vmem:[%s139_s4] sm:$0x1] }
  0xb5   :  { %141 = vst.msk [vmem:[#allocation2 + $0x28] sm:$0x1] %vm100_vm2, %v140_v9 }
  0xb6   :  { %v286_v28 = vsel %vm1540_vm5, %v1240_v25, %v285_v27 }
  0xb7   :  { %293 = vrot.lane.b32.xlu0 %v286_v28, %s1377_s6 }
  0xbf   :  { %288 = vrot.lane.b32.xlu0 %v256_v30, %s1378_s23 }
 0x129   :  { %v294_v31 = vpop.permute.xlu0 %293 }
 0x12a   :  { %v296_v32 = vmul.f32 %v294_v31, %v286_v28 }
 0x12c   :  { %298 = vrot.lane.b32.xlu1 %v296_v32, %s1378_s23 }
 0x131   :  { %v289_v33 = vpop.permute.xlu0 %288 }
 0x132   :  { %v291_v34 = vmul.f32 %v289_v33, %v286_v28 }
 0x19e   :  { %v299_v35 = vpop.permute.xlu1 %298 }
 0x19f   :  { %v301_v36 = vadd.f32 %v299_v35, %v291_v34 }
 0x1a1   :  { %1241 = vtanh.f32 %v301_v36 }
 0x1a7   :  { %v1242_v37 = vpop.eup %1241 }
 0x1a8   :  { %304 = vrot.lane.b32.xlu1 %v1242_v37, %s1377_s6 }
 0x21a   :  { %v305_v42 = vpop.permute.xlu1 %304 }
 0x21b   :  { %v307_v43 = vmul.f32 %v305_v42, %v286_v28  ;;  %v124_v28 = vld [vmem:[%s123_s21] sm:$0x1] }
 0x21c   :  { %125 = vst.msk [vmem:[#allocation2 + $0x18] sm:$0x1] %vm100_vm2, %v124_v28 }
 0x21d   :  { %309 = vrot.lane.b32.xlu2 %v307_v43, %s1378_s23 }
 0x223   :  { %v165_v30 = vld [vmem:[#allocation2 + $0x18] sm:$0xff] }
 0x224   :  { %1195 = vmatmul.msk.f32.gmra.mxu0 %vm88_vm0, %v165_v30 }
 0x277   :  { %v310_v47 = vpop.permute.xlu2 %309 }
 0x278   :  { %1201 = vmatmul.msk.f32.vlgmr.msra.gmra.mxu2 %vm88_vm0, %v310_v47  ;;  %1208 = vmatmul.msk.f32.vlgmr.msra.gmra.mxu3 %vm88_vm0, %v310_v47 }
 0x279   :  { %521 = vmatpush.msra.mxu2 %v1466_v3 }
 0x27b   :  { %522 = vmatpush.msra.mxu2 %v1472_v4 }
 0x27d   :  { %523 = vmatpush.msra.mxu2 %v1481_v7 }
 0x27f   :  { %524 = vmatpush.msra.mxu2 %v1499_v10 }
 0x2a1   :  { %v237_v34 = vpop.f32.mrf.mxu0 }
 0x2a2   :  { %v238_v35 = vadd.f32 %v1537_v16, %v237_v34 }
 0x2fb   :  { %v330_v50 = vpop.f32.mrf.mxu2 }
 0x2fc   :  { %v333_v51 = vadd.f32 %v330_v50, %v232_v49 }
 0x2fe   :  { %v334_v52 = vmul.f32 0.5, %v333_v51 }
 0x300   :  { %v335_v53 = vsel %vm1540_vm5, %v333_v51, %v334_v52  ;;  %v132_v52 = vld [vmem:[%s131_s29] sm:$0x1] }
 0x301   :  { %1243 = vtanh.f32 %v335_v53  ;;  %v136_v53 = vld [vmem:[%s135_s11] sm:$0x1]  ;;  %133 = vst.msk [vmem:[#allocation2 + $0x20] sm:$0x1] %vm100_vm2, %v132_v52 }
 0x302   :  { %137 = vst.msk [vmem:[#allocation2 + $0x21] sm:$0x1] %vm100_vm2, %v136_v53 }
 0x307   :  { %v1244_v54 = vpop.eup %1243 }
 0x308   :  { %v337_v55 = vmul.f32 0.5, %v1244_v54 }
 0x30a   :  { %v338_v56 = vadd.f32 0.5, %v337_v55 }
 0x30c   :  { %v339_v57 = vsel %vm1540_vm5, %v1244_v54, %v338_v56  ;;  %v166_v54 = vld [vmem:[#allocation2 + $0x20] sm:$0xff] }
 0x30d   :  { %342 = vrot.lane.b32.xlu2 %v339_v57, %s1377_s6  ;;  %v340_v60 = vmul.f32 %v339_v57, %v301_v36  ;;  %1196 = vmatmul.msk.f32.gmra.mxu0 %vm88_vm0, %v166_v54 }
 0x367   :  { %v343_v58 = vpop.permute.xlu2 %342 }
 0x368   :  { %v345_v59 = vmul.f32 %v343_v58, %v339_v57 }
 0x36a   :  { %347 = vrot.lane.b32.xlu0 %v345_v59, %s1378_s23 }
 0x38a   :  { %v240_v56 = vpop.f32.mrf.mxu0 }
 0x3dc   :  { %v348_v61 = vpop.permute.xlu0 %347 }
 0x3dd   :  { %v350_v62 = vadd.f32 %v348_v61, %v340_v60 }
 0x3df   :  { %1245 = vtanh.f32 %v350_v62 }
 0x3e5   :  { %v1246_v63 = vpop.eup %1245 }
 0x3e6   :  { %353 = vrot.lane.b32.xlu1 %v1246_v63, %s1377_s6 }
 0x458   :  { %v354_v5 = vpop.permute.xlu1 %353 }
 0x459   :  { %v356_v6 = vmul.f32 %v354_v5, %v339_v57  ;;  %v241_v57 = vadd.f32 %v1537_v16, %v240_v56 }
 0x45b   :  { %358 = vrot.lane.b32.xlu2 %v356_v6, %s1378_s23 }
 0x4b5   :  { %v359_v8 = vpop.permute.xlu2 %358 }
 0x4b6   :  { %1202 = vmatmul.msk.f32.vlgmr.msrb.gmra.mxu1 %vm88_vm0, %v359_v8  ;;  %1209 = vmatmul.msk.f32.gmra.mxu3 %vm88_vm0, %v359_v8 }
 0x4b7   :  { %570 = vmatpush.msrb.mxu1 %v1466_v3 }
 0x4b9   :  { %571 = vmatpush.msrb.mxu1 %v1472_v4 }
 0x4bb   :  { %572 = vmatpush.msrb.mxu1 %v1481_v7 }
 0x4bd   :  { %573 = vmatpush.msrb.mxu1 %v1499_v10 }
 0x533   :  { %v379_v12 = vpop.f32.mrf.mxu1 }
 0x534   :  { %v382_v13 = vadd.f32 %v379_v12, %v235_v11  ;;  %v144_v11 = vld [vmem:[%s143_s18] sm:$0x1] }
 0x535   :  { %145 = vst.msk [vmem:[#allocation2 + $0x29] sm:$0x1] %vm100_vm2, %v144_v11 }
 0x536   :  { %v383_v14 = vmul.f32 0.5, %v382_v13 }
 0x538   :  { %v384_v15 = vsel %vm1540_vm5, %v382_v13, %v383_v14 }
 0x539   :  { %1247 = vtanh.f32 %v384_v15 }
 0x53c   :  { %v167_v12 = vld [vmem:[#allocation2 + $0x28] sm:$0xff] }
 0x53d   :  { %1197 = vmatmul.msk.f32.gmra.mxu0 %vm88_vm0, %v167_v12 }
 0x53f   :  { %v1248_v17 = vpop.eup %1247 }
 0x540   :  { %v386_v18 = vmul.f32 0.5, %v1248_v17 }
 0x542   :  { %v387_v19 = vadd.f32 0.5, %v386_v18 }
 0x544   :  { %v388_v20 = vsel %vm1540_vm5, %v1248_v17, %v387_v19 }
 0x545   :  { %391 = vrot.lane.b32.xlu0 %v388_v20, %s1377_s6  ;;  %v389_v24 = vmul.f32 %v388_v20, %v350_v62 }
 0x5b7   :  { %v392_v21 = vpop.permute.xlu0 %391 }
 0x5b8   :  { %v394_v23 = vmul.f32 %v392_v21, %v388_v20 }
 0x5ba   :  { %396 = vrot.lane.b32.xlu1 %v394_v23, %s1378_s23  ;;  %v243_v14 = vpop.f32.mrf.mxu0 }
 0x5bb   :  { %v244_v15 = vadd.f32 %v1537_v16, %v243_v14 }
 0x62c   :  { %v397_v25 = vpop.permute.xlu1 %396 }
 0x62d   :  { %v399_v26 = vadd.f32 %v397_v25, %v389_v24 }
 0x62f   :  { %1249 = vtanh.f32 %v399_v26 }
 0x635   :  { %v1250_v27 = vpop.eup %1249 }
 0x636   :  { %402 = vrot.lane.b32.xlu2 %v1250_v27, %s1377_s6 }
 0x690   :  { %v403_v31 = vpop.permute.xlu2 %402 }
 0x691   :  { %v405_v32 = vmul.f32 %v403_v31, %v388_v20 }
 0x693   :  { %407 = vrot.lane.b32.xlu0 %v405_v32, %s1378_s23  ;;  %v148_v32 = vld [vmem:[%s147_s8] sm:$0x1] }
 0x694   :  { %149 = vst.msk [vmem:[#allocation2 + $0x30] sm:$0x1] %vm100_vm2, %v148_v32 }
 0x705   :  { %v408_v33 = vpop.permute.xlu0 %407 }
 0x706   :  { %1203 = vmatmul.msk.f32.vlgmr.msra.gmra.mxu1 %vm88_vm0, %v408_v33  ;;  %1210 = vmatmul.msk.f32.gmra.mxu3 %vm88_vm0, %v408_v33  ;;  %v152_v33 = vld [vmem:[%s151_s25] sm:$0x1] }
 0x707   :  { %153 = vst.msk [vmem:[#allocation2 + $0x31] sm:$0x1] %vm100_vm2, %v152_v33 }
 0x70e   :  { %v168_v34 = vld [vmem:[#allocation2 + $0x30] sm:$0xff] }
 0x70f   :  { %1198 = vmatmul.msk.f32.gmra.mxu0 %vm88_vm0, %v168_v34 }
 0x783   :  { %v428_v36 = vpop.f32.mrf.mxu1 }
 0x784   :  { %v431_v37 = vadd.f32 %v428_v36, %v238_v35 }
 0x786   :  { %v432_v38 = vmul.f32 0.5, %v431_v37 }
 0x788   :  { %v433_v39 = vsel %vm1540_vm5, %v431_v37, %v432_v38  ;;  %v1681_v37 = vld [vmem:[#allocation8 + $0x18] sm:$0xff]  ;;  %v1683_v38 = vld [vmem:[#allocation8 + $0x10] sm:$0xff] }
 0x789   :  { %1251 = vtanh.f32 %v433_v39  ;;  %730 = vmatpush.msra.mxu1 %v1681_v37  ;;  %v1687_v39 = vld [vmem:[#allocation8 + $0x8] sm:$0xff] }
 0x78b   :  { %731 = vmatpush.msra.mxu1 %v1683_v38 }
 0x78d   :  { %732 = vmatpush.msra.mxu1 %v1687_v39 }
 0x78f   :  { %v1252_v40 = vpop.eup %1251 }
 0x790   :  { %v435_v41 = vmul.f32 0.5, %v1252_v40 }
 0x792   :  { %v436_v42 = vadd.f32 0.5, %v435_v41 }
 0x794   :  { %v437_v43 = vsel %vm1540_vm5, %v1252_v40, %v436_v42  ;;  %v1691_v40 = vld [vmem:[#allocation8] sm:$0xff] }
 0x795   :  { %440 = vrot.lane.b32.xlu1 %v437_v43, %s1377_s6  ;;  %v438_v46 = vmul.f32 %v437_v43, %v399_v26  ;;  %733 = vmatpush.msra.mxu1 %v1691_v40  ;;  %v1216_v42 = vld [vmem:[%s1871_s2 + $0x2] sm:$0x3] }
 0x807   :  { %v441_v44 = vpop.permute.xlu1 %440 }
 0x808   :  { %v443_v45 = vmul.f32 %v441_v44, %v437_v43  ;;  %v246_v44 = vpop.f32.mrf.mxu0 }
 0x80a   :  { %445 = vrot.lane.b32.xlu2 %v443_v45, %s1378_s23  ;;  %v247_v45 = vadd.f32 %v1537_v16, %v246_v44 }
 0x864   :  { %v446_v47 = vpop.permute.xlu2 %445 }
 0x865   :  { %v448_v48 = vadd.f32 %v446_v47, %v438_v46 }
 0x867   :  { %1253 = vtanh.f32 %v448_v48 }
 0x86d   :  { %v1254_v49 = vpop.eup %1253 }
 0x86e   :  { %451 = vrot.lane.b32.xlu0 %v1254_v49, %s1377_s6 }
 0x8e0   :  { %v452_v50 = vpop.permute.xlu0 %451 }
 0x8e1   :  { %v454_v51 = vmul.f32 %v452_v50, %v437_v43  ;;  %v711_v43 = vsel %vm253_vm1, %v1216_v42, 0.0  ;;  %v685_v50 = vpop.f32.mrf.mxu3 }
 0x8e3   :  { %456 = vrot.lane.b32.xlu1 %v454_v51, %s1378_s23 }
 0x955   :  { %v457_v55 = vpop.permute.xlu1 %456 }
 0x956   :  { %1204 = vmatmul.msk.f32.vlgmr.msrb.gmra.mxu2 %vm88_vm0, %v457_v55  ;;  %1211 = vmatmul.msk.f32.gmra.mxu3 %vm88_vm0, %v457_v55 }
 0x957   :  { %619 = vmatpush.msrb.mxu2 %v1466_v3 }
 0x959   :  { %620 = vmatpush.msrb.mxu2 %v1472_v4 }
 0x95b   :  { %621 = vmatpush.msrb.mxu2 %v1481_v7 }
 0x95d   :  { %622 = vmatpush.msrb.mxu2 %v1499_v10 }
 0x9d9   :  { %v477_v58 = vpop.f32.mrf.mxu2 }
 0x9da   :  { %v480_v59 = vadd.f32 %v477_v58, %v241_v57 }
 0x9dc   :  { %v481_v60 = vmul.f32 0.5, %v480_v59 }
 0x9de   :  { %v482_v61 = vsel %vm1540_vm5, %v480_v59, %v481_v60 }
 0x9df   :  { %1255 = vtanh.f32 %v482_v61 }
 0x9e5   :  { %v1256_v62 = vpop.eup %1255 }
 0x9e6   :  { %v484_v63 = vmul.f32 0.5, %v1256_v62 }
 0x9e8   :  { %v485_v0 = vadd.f32 0.5, %v484_v63 }
 0x9ea   :  { %v486_v3 = vsel %vm1540_vm5, %v1256_v62, %v485_v0  ;;  %v1217_v62 = vld [vmem:[%s1872_s3 + $0x2] sm:$0x3]  ;;  %s1190_s3 = sld [smem:[#allocation4 + $0x7]] }
 0x9eb   :  { %489 = vrot.lane.b32.xlu2 %v486_v3, %s1377_s6  ;;  %v487_v10 = vmul.f32 %v486_v3, %v448_v48  ;;  %v1716_v48 = vld [vmem:[%s1878_s9] ss:$0 sm:$0xff] }
 0x9ec   :  { %v686_v52 = vadd.f32 %v1716_v48, %v685_v50 }
 0x9f0   :  { %s155_s14 = scalar_lea.vmem %s1870_s1, %s1190_s3 }
 0xa45   :  { %v490_v4 = vpop.permute.xlu2 %489 }
 0xa46   :  { %v492_v7 = vmul.f32 %v490_v4, %v486_v3 }
 0xa48   :  { %494 = vrot.lane.b32.xlu0 %v492_v7, %s1378_s23 }
 0xaba   :  { %v495_v1 = vpop.permute.xlu0 %494 }
 0xabb   :  { %v497_v2 = vadd.f32 %v495_v1, %v487_v10 }
 0xabd   :  { %1257 = vtanh.f32 %v497_v2 }
 0xac3   :  { %v1258_v5 = vpop.eup %1257 }
 0xac4   :  { %500 = vrot.lane.b32.xlu1 %v1258_v5, %s1377_s6 }
 0xb36   :  { %v501_v6 = vpop.permute.xlu1 %500 }
 0xb37   :  { %v503_v8 = vmul.f32 %v501_v6, %v486_v3  ;;  %v714_v3 = vsel %vm253_vm1, %v1217_v62, 0.0 }
 0xb39   :  { %505 = vrot.lane.b32.xlu2 %v503_v8, %s1378_s23 }
 0xb93   :  { %v506_v13 = vpop.permute.xlu2 %505 }
 0xb94   :  { %1205 = vmatmul.msk.f32.vlgmr.msra.gmra.mxu2 %vm88_vm0, %v506_v13  ;;  %1212 = vmatmul.msk.f32.gmra.mxu3 %vm88_vm0, %v506_v13 }
 0xb95   :  { %783 = vmatpush.msra.mxu2 %v1681_v37 }
 0xb97   :  { %784 = vmatpush.msra.mxu2 %v1683_v38 }
 0xb99   :  { %785 = vmatpush.msra.mxu2 %v1687_v39 }
 0xb9b   :  { %786 = vmatpush.msra.mxu2 %v1691_v40 }
 0xc17   :  { %v526_v17 = vpop.f32.mrf.mxu2 }
 0xc18   :  { %v529_v18 = vadd.f32 %v526_v17, %v244_v15 }
 0xc1a   :  { %v530_v19 = vmul.f32 0.5, %v529_v18 }
 0xc1c   :  { %v531_v20 = vsel %vm1540_vm5, %v529_v18, %v530_v19 }
 0xc1d   :  { %1259 = vtanh.f32 %v531_v20 }
 0xc23   :  { %v1260_v21 = vpop.eup %1259 }
 0xc24   :  { %v533_v23 = vmul.f32 0.5, %v1260_v21 }
 0xc26   :  { %v534_v24 = vadd.f32 0.5, %v533_v23  ;;  %v160_v23 = vld [vmem:[%s159_s17] sm:$0x1] }
 0xc27   :  { %161 = vst.msk [vmem:[#allocation2 + $0x39] sm:$0x1] %vm100_vm2, %v160_v23 }
 0xc28   :  { %v535_v25 = vsel %vm1540_vm5, %v1260_v21, %v534_v24  ;;  %v156_v21 = vld [vmem:[%s155_s14] sm:$0x1] }
 0xc29   :  { %538 = vrot.lane.b32.xlu0 %v535_v25, %s1377_s6  ;;  %v536_v28 = vmul.f32 %v535_v25, %v497_v2  ;;  %157 = vst.msk [vmem:[#allocation2 + $0x38] sm:$0x1] %vm100_vm2, %v156_v21 }
 0xc30   :  { %v169_v24 = vld [vmem:[#allocation2 + $0x38] sm:$0xff] }
 0xc31   :  { %1199 = vmatmul.msk.f32.gmra.mxu0 %vm88_vm0, %v169_v24 }
 0xc9b   :  { %v539_v26 = vpop.permute.xlu0 %538 }
 0xc9c   :  { %v541_v27 = vmul.f32 %v539_v26, %v535_v25 }
 0xc9e   :  { %543 = vrot.lane.b32.xlu1 %v541_v27, %s1378_s23 }
 0xd10   :  { %v544_v29 = vpop.permute.xlu1 %543 }
 0xd11   :  { %v1667_v30 = vadd.f32 %v544_v29, %v536_v28  ;;  %v688_v28 = vpop.f32.mrf.mxu3 }
 0xd12   :  { %v689_v29 = vadd.f32 %v1716_v48, %v688_v28 }
 0xd13   :  { %1261 = vtanh.f32 %v1667_v30 }
 0xd19   :  { %v1262_v31 = vpop.eup %1261 }
 0xd1a   :  { %549 = vrot.lane.b32.xlu2 %v1262_v31, %s1377_s6 }
 0xd74   :  { %v550_v35 = vpop.permute.xlu2 %549 }
 0xd75   :  { %v552_v36 = vmul.f32 %v550_v35, %v535_v25 }
 0xd77   :  { %554 = vrot.lane.b32.xlu0 %v552_v36, %s1378_s23 }
 0xde9   :  { %v555_v41 = vpop.permute.xlu0 %554 }
 0xdea   :  { %1206 = vmatmul.msk.f32.vlgmr.msrb.gmra.mxu1 %vm88_vm0, %v555_v41  ;;  %1213 = vmatmul.msk.f32.gmra.mxu3 %vm88_vm0, %v555_v41 }
 0xdeb   :  { %832 = vmatpush.msrb.mxu1 %v1681_v37 }
 0xded   :  { %833 = vmatpush.msrb.mxu1 %v1683_v38 }
 0xdef   :  { %834 = vmatpush.msrb.mxu1 %v1687_v39 }
 0xdf1   :  { %835 = vmatpush.msrb.mxu1 %v1691_v40 }
 0xdf2   :  { %1218 = vmatmul.msk.f32.vlgmr.msra.gmra.mxu1 %vm88_vm0, %v711_v43 }
 0xdf3   :  { %930 = vmatpush.msra.mxu1 %v1681_v37 }
 0xdf5   :  { %931 = vmatpush.msra.mxu1 %v1683_v38 }
 0xdf7   :  { %932 = vmatpush.msra.mxu1 %v1687_v39 }
 0xdf9   :  { %933 = vmatpush.msra.mxu1 %v1691_v40 }
 0xe67   :  { %v575_v46 = vpop.f32.mrf.mxu1 }
 0xe68   :  { %v578_v47 = vadd.f32 %v575_v46, %v247_v45 }
 0xe6a   :  { %v579_v49 = vmul.f32 0.5, %v578_v47 }
 0xe6c   :  { %v580_v51 = vsel %vm1540_vm5, %v578_v47, %v579_v49 }
 0xe6d   :  { %1263 = vtanh.f32 %v580_v51 }
 0xe6f   :  { %v735_v53 = vpop.f32.mrf.mxu1 }
 0xe70   :  { %v738_v54 = vadd.f32 %v735_v53, %v686_v52  ;;  %v691_v52 = vpop.f32.mrf.mxu3 }
 0xe71   :  { %v692_v53 = vadd.f32 %v1716_v48, %v691_v52 }
 0xe72   :  { %v739_v55 = vmul.f32 0.5, %v738_v54 }
 0xe73   :  { %v1264_v56 = vpop.eup %1263 }
 0xe74   :  { %v740_v57 = vsel %vm1540_vm5, %v738_v54, %v739_v55  ;;  %v582_v58 = vmul.f32 0.5, %v1264_v56 }
 0xe75   :  { %1265 = vtanh.f32 %v740_v57 }
 0xe76   :  { %v583_v59 = vadd.f32 0.5, %v582_v58 }
 0xe78   :  { %v584_v60 = vsel %vm1540_vm5, %v1264_v56, %v583_v59 }
 0xe79   :  { %587 = vrot.lane.b32.xlu1 %v584_v60, %s1377_s6  ;;  %v585_v12 = vmul.f32 %v584_v60, %v1667_v30 }
 0xe7b   :  { %v1266_v61 = vpop.eup %1265 }
 0xe7c   :  { %v742_v63 = vmul.f32 0.5, %v1266_v61 }
 0xe7e   :  { %v743_v0 = vadd.f32 0.5, %v742_v63 }
 0xe80   :  { %v744_v4 = vsel %vm1540_vm5, %v1266_v61, %v743_v0 }
 0xe81   :  { %751 = vrot.lane.b32.xlu2 %v744_v4, %s1377_s6  ;;  %746 = vrot.lane.b32.xlu1 %v714_v3, %s1378_s23 }
 0xedb   :  { %v752_v7 = vpop.permute.xlu2 %751 }
 0xedc   :  { %v754_v10 = vmul.f32 %v752_v7, %v744_v4 }
 0xede   :  { %756 = vrot.lane.b32.xlu2 %v754_v10, %s1378_s23 }
 0xeeb   :  { %v588_v1 = vpop.permute.xlu1 %587 }
 0xeec   :  { %v590_v2 = vmul.f32 %v588_v1, %v584_v60 }
 0xeee   :  { %592 = vrot.lane.b32.xlu0 %v590_v2, %s1378_s23 }
 0xef3   :  { %v747_v5 = vpop.permute.xlu1 %746 }
 0xef4   :  { %v749_v6 = vmul.f32 %v747_v5, %v744_v4  ;;  %v694_v5 = vpop.f32.mrf.mxu3 }
 0xf38   :  { %v757_v8 = vpop.permute.xlu2 %756 }
 0xf39   :  { %v759_v9 = vadd.f32 %v757_v8, %v749_v6  ;;  %v695_v6 = vadd.f32 %v1716_v48, %v694_v5 }
 0xf3b   :  { %1267 = vtanh.f32 %v759_v9 }
 0xf41   :  { %v1268_v11 = vpop.eup %1267 }
 0xf42   :  { %762 = vrot.lane.b32.xlu1 %v1268_v11, %s1377_s6 }
 0xf60   :  { %v593_v13 = vpop.permute.xlu0 %592 }
 0xf61   :  { %v1738_v14 = vadd.f32 %v593_v13, %v585_v12 }
 0xf63   :  { %1269 = vtanh.f32 %v1738_v14 }
 0xf69   :  { %v1270_v15 = vpop.eup %1269 }
 0xf6a   :  { %598 = vrot.lane.b32.xlu0 %v1270_v15, %s1377_s6 }
 0xfb4   :  { %v763_v17 = vpop.permute.xlu1 %762 }
 0xfb5   :  { %v765_v18 = vmul.f32 %v763_v17, %v744_v4 }
 0xfb7   :  { %767 = vrot.lane.b32.xlu0 %v765_v18, %s1378_s23 }
 0xfdc   :  { %v599_v19 = vpop.permute.xlu0 %598 }
 0xfdd   :  { %v601_v20 = vmul.f32 %v599_v19, %v584_v60 }
 0xfdf   :  { %603 = vrot.lane.b32.xlu2 %v601_v20, %s1378_s23 }
0x1029   :  { %v768_v26 = vpop.permute.xlu0 %767 }
0x1039   :  { %v604_v25 = vpop.permute.xlu2 %603 }
0x103a   :  { %1207 = vmatmul.msk.f32.vlgmr.msrb.gmra.mxu2 %vm88_vm0, %v604_v25  ;;  %1214 = vmatmul.msk.f32.gmra.mxu3 %vm88_vm0, %v604_v25  ;;  %v697_v25 = vpop.f32.mrf.mxu3 }
0x103b   :  { %881 = vmatpush.msrb.mxu2 %v1681_v37 }
0x103d   :  { %882 = vmatpush.msrb.mxu2 %v1683_v38 }
0x103f   :  { %883 = vmatpush.msrb.mxu2 %v1687_v39 }
0x1041   :  { %884 = vmatpush.msrb.mxu2 %v1691_v40 }
0x1042   :  { %1219 = vmatmul.msk.f32.vlgmr.msra.gmra.mxu2 %vm88_vm0, %v768_v26  ;;  %v698_v26 = vadd.f32 %v1716_v48, %v697_v25 }
0x1043   :  { %979 = vmatpush.msra.mxu2 %v1681_v37 }
0x1045   :  { %980 = vmatpush.msra.mxu2 %v1683_v38 }
0x1047   :  { %981 = vmatpush.msra.mxu2 %v1687_v39 }
0x1049   :  { %982 = vmatpush.msra.mxu2 %v1691_v40 }
0x10bd   :  { %v1764_v27 = vpop.f32.mrf.mxu2 }
0x10c5   :  { %v788_v30 = vpop.f32.mrf.mxu2 }
0x10c6   :  { %v791_v31 = vadd.f32 %v788_v30, %v689_v29 }
0x10c8   :  { %v792_v32 = vmul.f32 0.5, %v791_v31 }
0x10ca   :  { %v793_v33 = vsel %vm1540_vm5, %v791_v31, %v792_v32 }
0x10cb   :  { %1271 = vtanh.f32 %v793_v33 }
0x10d1   :  { %v1272_v34 = vpop.eup %1271 }
0x10d2   :  { %v795_v35 = vmul.f32 0.5, %v1272_v34 }
0x10d4   :  { %v796_v36 = vadd.f32 0.5, %v795_v35 }
0x10d6   :  { %v797_v41 = vsel %vm1540_vm5, %v1272_v34, %v796_v36 }
0x10d7   :  { %800 = vrot.lane.b32.xlu1 %v797_v41, %s1377_s6  ;;  %v798_v44 = vmul.f32 %v797_v41, %v759_v9 }
0x1149   :  { %v801_v42 = vpop.permute.xlu1 %800 }
0x114a   :  { %v803_v43 = vmul.f32 %v801_v42, %v797_v41 }
0x114c   :  { %805 = vrot.lane.b32.xlu2 %v803_v43, %s1378_s23 }
0x11a6   :  { %v806_v45 = vpop.permute.xlu2 %805 }
0x11a7   :  { %v808_v46 = vadd.f32 %v806_v45, %v798_v44 }
0x11a9   :  { %1273 = vtanh.f32 %v808_v46 }
0x11af   :  { %v1274_v47 = vpop.eup %1273 }
0x11b0   :  { %811 = vrot.lane.b32.xlu0 %v1274_v47, %s1377_s6 }
0x1222   :  { %v812_v49 = vpop.permute.xlu0 %811 }
0x1223   :  { %v814_v50 = vmul.f32 %v812_v49, %v797_v41 }
0x1225   :  { %816 = vrot.lane.b32.xlu1 %v814_v50, %s1378_s23  ;;  %v700_v50 = vpop.f32.mrf.mxu3 }
0x1297   :  { %v817_v51 = vpop.permute.xlu1 %816 }
0x1298   :  { %1220 = vmatmul.msk.f32.vlgmr.msrb.gmra.mxu1 %vm88_vm0, %v817_v51  ;;  %v701_v51 = vadd.f32 %v1716_v48, %v700_v50 }
0x1299   :  { %1028 = vmatpush.msrb.mxu1 %v1681_v37 }
0x129b   :  { %1029 = vmatpush.msrb.mxu1 %v1683_v38 }
0x129d   :  { %1030 = vmatpush.msrb.mxu1 %v1687_v39 }
0x129f   :  { %1031 = vmatpush.msrb.mxu1 %v1691_v40 }
0x1315   :  { %v837_v54 = vpop.f32.mrf.mxu1 }
0x1316   :  { %v840_v55 = vadd.f32 %v837_v54, %v692_v53 }
0x1318   :  { %v841_v56 = vmul.f32 0.5, %v840_v55 }
0x131a   :  { %v842_v57 = vsel %vm1540_vm5, %v840_v55, %v841_v56 }
0x131b   :  { %1275 = vtanh.f32 %v842_v57 }
0x1321   :  { %v1276_v58 = vpop.eup %1275 }
0x1322   :  { %v844_v59 = vmul.f32 0.5, %v1276_v58 }
0x1324   :  { %v845_v60 = vadd.f32 0.5, %v844_v59 }
0x1326   :  { %v846_v61 = vsel %vm1540_vm5, %v1276_v58, %v845_v60  ;;  %v249_v60 = vpop.f32.mrf.mxu0 }
0x1327   :  { %849 = vrot.lane.b32.xlu2 %v846_v61, %s1377_s6  ;;  %v847_v0 = vmul.f32 %v846_v61, %v808_v46 }
0x1381   :  { %v850_v62 = vpop.permute.xlu2 %849 }
0x1382   :  { %v852_v63 = vmul.f32 %v850_v62, %v846_v61 }
0x1384   :  { %854 = vrot.lane.b32.xlu0 %v852_v63, %s1378_s23 }
0x13f6   :  { %v855_v3 = vpop.permute.xlu0 %854 }
0x13f7   :  { %v857_v4 = vadd.f32 %v855_v3, %v847_v0 }
0x13f9   :  { %1277 = vtanh.f32 %v857_v4 }
0x13ff   :  { %v1278_v7 = vpop.eup %1277 }
0x1400   :  { %860 = vrot.lane.b32.xlu1 %v1278_v7, %s1377_s6 }
0x1472   :  { %v861_v10 = vpop.permute.xlu1 %860 }
0x1473   :  { %v863_v1 = vmul.f32 %v861_v10, %v846_v61  ;;  %v250_v61 = vadd.f32 %v1537_v16, %v249_v60 }
0x1475   :  { %865 = vrot.lane.b32.xlu2 %v863_v1, %s1378_s23  ;;  %v627_v62 = vadd.f32 %v1764_v27, %v250_v61 }
0x1477   :  { %v628_v63 = vmul.f32 0.5, %v627_v62 }
0x1479   :  { %v629_v0 = vsel %vm1540_vm5, %v627_v62, %v628_v63 }
0x14cf   :  { %v866_v2 = vpop.permute.xlu2 %865 }
0x14d0   :  { %1221 = vmatmul.msk.f32.vlgmr.msrb.gmra.mxu2 %vm88_vm0, %v866_v2 }
0x14d1   :  { %1077 = vmatpush.msrb.mxu2 %v1681_v37 }
0x14d3   :  { %1078 = vmatpush.msrb.mxu2 %v1683_v38 }
0x14d5   :  { %1079 = vmatpush.msrb.mxu2 %v1687_v39 }
0x14d7   :  { %1080 = vmatpush.msrb.mxu2 %v1691_v40 }
0x1553   :  { %v886_v8 = vpop.f32.mrf.mxu2 }
0x1554   :  { %v889_v9 = vadd.f32 %v886_v8, %v695_v6 }
0x1556   :  { %v890_v11 = vmul.f32 0.5, %v889_v9 }
0x1558   :  { %v891_v12 = vsel %vm1540_vm5, %v889_v9, %v890_v11 }
0x1559   :  { %1279 = vtanh.f32 %v891_v12 }
0x155f   :  { %v1280_v13 = vpop.eup %1279 }
0x1560   :  { %v893_v15 = vmul.f32 0.5, %v1280_v13 }
0x1562   :  { %v894_v17 = vadd.f32 0.5, %v893_v15  ;;  %v703_v15 = vpop.f32.mrf.mxu3 }
0x1564   :  { %v895_v37 = vsel %vm1540_vm5, %v1280_v13, %v894_v17  ;;  %v704_v17 = vadd.f32 %v1716_v48, %v703_v15 }
0x1565   :  { %898 = vrot.lane.b32.xlu0 %v895_v37, %s1377_s6  ;;  %v896_v40 = vmul.f32 %v895_v37, %v857_v4 }
0x15d7   :  { %v899_v38 = vpop.permute.xlu0 %898 }
0x15d8   :  { %v901_v39 = vmul.f32 %v899_v38, %v895_v37 }
0x15da   :  { %903 = vrot.lane.b32.xlu1 %v901_v39, %s1378_s23 }
0x164c   :  { %v904_v18 = vpop.permute.xlu1 %903 }
0x164d   :  { %v906_v19 = vadd.f32 %v904_v18, %v896_v40 }
0x164f   :  { %1281 = vtanh.f32 %v906_v19 }
0x1655   :  { %v1282_v20 = vpop.eup %1281 }
0x1656   :  { %909 = vrot.lane.b32.xlu2 %v1282_v20, %s1377_s6 }
0x16b0   :  { %v910_v21 = vpop.permute.xlu2 %909 }
0x16b1   :  { %v912_v23 = vmul.f32 %v910_v21, %v895_v37 }
0x16b3   :  { %914 = vrot.lane.b32.xlu0 %v912_v23, %s1378_s23 }
0x1725   :  { %v915_v24 = vpop.permute.xlu0 %914 }
0x1726   :  { %1222 = vmatmul.msk.f32.vlgmr.msra.gmra.mxu1 %vm88_vm0, %v915_v24 }
0x17a3   :  { %v935_v28 = vpop.f32.mrf.mxu1 }
0x17a4   :  { %v938_v29 = vadd.f32 %v935_v28, %v698_v26 }
0x17a6   :  { %v939_v30 = vmul.f32 0.5, %v938_v29 }
0x17a8   :  { %v940_v31 = vsel %vm1540_vm5, %v938_v29, %v939_v30 }
0x17a9   :  { %1283 = vtanh.f32 %v940_v31 }
0x17af   :  { %v1284_v32 = vpop.eup %1283 }
0x17b0   :  { %v942_v33 = vmul.f32 0.5, %v1284_v32 }
0x17b2   :  { %v943_v34 = vadd.f32 0.5, %v942_v33 }
0x17b4   :  { %v944_v35 = vsel %vm1540_vm5, %v1284_v32, %v943_v34 }
0x17b5   :  { %947 = vrot.lane.b32.xlu1 %v944_v35, %s1377_s6  ;;  %v945_v42 = vmul.f32 %v944_v35, %v906_v19 }
0x1827   :  { %v948_v36 = vpop.permute.xlu1 %947 }
0x1828   :  { %v950_v41 = vmul.f32 %v948_v36, %v944_v35 }
0x182a   :  { %952 = vrot.lane.b32.xlu2 %v950_v41, %s1378_s23 }
0x1884   :  { %v953_v43 = vpop.permute.xlu2 %952 }
0x1885   :  { %v955_v44 = vadd.f32 %v953_v43, %v945_v42 }
0x1887   :  { %1285 = vtanh.f32 %v955_v44 }
0x188d   :  { %v1286_v45 = vpop.eup %1285 }
0x188e   :  { %958 = vrot.lane.b32.xlu0 %v1286_v45, %s1377_s6 }
0x1900   :  { %v959_v46 = vpop.permute.xlu0 %958 }
0x1901   :  { %v961_v47 = vmul.f32 %v959_v46, %v944_v35 }
0x1903   :  { %963 = vrot.lane.b32.xlu1 %v961_v47, %s1378_s23 }
0x1975   :  { %v964_v49 = vpop.permute.xlu1 %963 }
0x1976   :  { %1223 = vmatmul.msk.f32.vlgmr.msra.gmra.mxu2 %vm88_vm0, %v964_v49 }
0x19f9   :  { %v984_v52 = vpop.f32.mrf.mxu2 }
0x19fa   :  { %v987_v53 = vadd.f32 %v984_v52, %v701_v51 }
0x19fc   :  { %v988_v54 = vmul.f32 0.5, %v987_v53 }
0x19fe   :  { %v989_v55 = vsel %vm1540_vm5, %v987_v53, %v988_v54 }
0x19ff   :  { %1287 = vtanh.f32 %v989_v55 }
0x1a00   :  { %1289 = vtanh.f32 %v629_v0 }
0x1a05   :  { %v1288_v56 = vpop.eup %1287 }
0x1a06   :  { %v991_v57 = vmul.f32 0.5, %v1288_v56  ;;  %v1290_v3 = vpop.eup %1289 }
0x1a07   :  { %v631_v10 = vmul.f32 0.5, %v1290_v3 }
0x1a08   :  { %v992_v58 = vadd.f32 0.5, %v991_v57 }
0x1a09   :  { %v632_v1 = vadd.f32 0.5, %v631_v10 }
0x1a0a   :  { %v993_v59 = vsel %vm1540_vm5, %v1288_v56, %v992_v58 }
0x1a0b   :  { %996 = vrot.lane.b32.xlu2 %v993_v59, %s1377_s6  ;;  %v633_v2 = vsel %vm1540_vm5, %v1290_v3, %v632_v1  ;;  %v994_v16 = vmul.f32 %v993_v59, %v955_v44 }
0x1a0c   :  { %v634_v20 = vmul.f32 %v633_v2, %v1738_v14 }
0x1a65   :  { %v997_v4 = vpop.permute.xlu2 %996 }
0x1a66   :  { %v999_v7 = vmul.f32 %v997_v4, %v993_v59 }
0x1a68   :  { %1001 = vrot.lane.b32.xlu0 %v999_v7, %s1378_s23 }
0x1a70   :  { %636 = vrot.lane.b32.xlu0 %v633_v2, %s1377_s6 }
0x1ada   :  { %v1002_v5 = vpop.permute.xlu0 %1001 }
0x1adb   :  { %v1004_v27 = vadd.f32 %v1002_v5, %v994_v16  ;;  %v1238_v16 = vld [vmem:[#allocation3] ss:$0 sm:$0xff] }
0x1add   :  { %1291 = vtanh.f32 %v1004_v27 }
0x1ae2   :  { %v637_v11 = vpop.permute.xlu0 %636 }
0x1ae3   :  { %v1292_v6 = vpop.eup %1291  ;;  %v639_v12 = vmul.f32 %v637_v11, %v633_v2 }
0x1ae4   :  { %1007 = vrot.lane.b32.xlu1 %v1292_v6, %s1377_s6 }
0x1b56   :  { %v1008_v8 = vpop.permute.xlu1 %1007 }
0x1b57   :  { %v1010_v9 = vmul.f32 %v1008_v8, %v993_v59 }
0x1b59   :  { %1012 = vrot.lane.b32.xlu2 %v1010_v9, %s1378_s23 }
0x1b61   :  { %641 = vrot.lane.b32.xlu2 %v639_v12, %s1378_s23 }
0x1bb3   :  { %v1013_v13 = vpop.permute.xlu2 %1012 }
0x1bb4   :  { %1224 = vmatmul.msk.f32.vlgmr.msrb.gmra.mxu1 %vm88_vm0, %v1013_v13 }
0x1bbb   :  { %v642_v19 = vpop.permute.xlu2 %641 }
0x1bbc   :  { %v644_v23 = vadd.f32 %v642_v19, %v634_v20 }
0x1c31   :  { %v1033_v37 = vpop.f32.mrf.mxu1 }
0x1c32   :  { %v1036_v38 = vadd.f32 %v1033_v37, %v704_v17 }
0x1c34   :  { %v1037_v39 = vmul.f32 0.5, %v1036_v38 }
0x1c36   :  { %v1038_v40 = vsel %vm1540_vm5, %v1036_v38, %v1037_v39 }
0x1c37   :  { %1293 = vtanh.f32 %v1038_v40 }
0x1c38   :  { %1295 = vtanh.f32 %v644_v23 }
0x1c3d   :  { %v1294_v18 = vpop.eup %1293 }
0x1c3e   :  { %v1040_v21 = vmul.f32 0.5, %v1294_v18  ;;  %v1296_v26 = vpop.eup %1295 }
0x1c40   :  { %v1041_v24 = vadd.f32 0.5, %v1040_v21 }
0x1c42   :  { %v1042_v25 = vsel %vm1540_vm5, %v1294_v18, %v1041_v24 }
0x1c43   :  { %1045 = vrot.lane.b32.xlu1 %v1042_v25, %s1377_s6  ;;  %v1043_v14 = vmul.f32 %v1042_v25, %v1004_v27 }
0x1c4b   :  { %647 = vrot.lane.b32.xlu1 %v1296_v26, %s1377_s6 }
0x1cb5   :  { %v1046_v28 = vpop.permute.xlu1 %1045 }
0x1cb6   :  { %v1048_v29 = vmul.f32 %v1046_v28, %v1042_v25 }
0x1cb8   :  { %1050 = vrot.lane.b32.xlu0 %v1048_v29, %s1378_s23 }
0x1cbd   :  { %v648_v30 = vpop.permute.xlu1 %647 }
0x1cbe   :  { %v650_v31 = vmul.f32 %v648_v30, %v633_v2 }
0x1cc0   :  { %664 = vrot.lane.b32.xlu0 %v650_v31, %s1378_s23 }
0x1d2a   :  { %v1051_v32 = vpop.permute.xlu0 %1050 }
0x1d2b   :  { %v1053_v33 = vadd.f32 %v1051_v32, %v1043_v14 }
0x1d2d   :  { %1297 = vtanh.f32 %v1053_v33 }
0x1d32   :  { %v665_v34 = vpop.permute.xlu0 %664 }
0x1d33   :  { %v1298_v35 = vpop.eup %1297  ;;  %1215 = vmatmul.msk.f32.gmra.mxu3 %vm88_vm0, %v665_v34 }
0x1d34   :  { %1056 = vrot.lane.b32.xlu2 %v1298_v35, %s1377_s6 }
0x1d8e   :  { %v1057_v36 = vpop.permute.xlu2 %1056 }
0x1d8f   :  { %v1059_v41 = vmul.f32 %v1057_v36, %v1042_v25 }
0x1d91   :  { %1061 = vrot.lane.b32.xlu1 %v1059_v41, %s1378_s23 }
0x1db6   :  { %v706_v43 = vpop.f32.mrf.mxu3 }
0x1db7   :  { %v707_v44 = vadd.f32 %v1716_v48, %v706_v43  ;;  %v1237_v48 = vld [vmem:[%s1879_s10] ss:$0 sm:$0xff] }
0x1e03   :  { %v1062_v42 = vpop.permute.xlu1 %1061 }
0x1e04   :  { %1225 = vmatmul.msk.f32.vlgmr.msrb.gmra.mxu2 %vm88_vm0, %v1062_v42 }
0x1e87   :  { %v1082_v45 = vpop.f32.mrf.mxu2 }
0x1e88   :  { %v1085_v46 = vadd.f32 %v1082_v45, %v707_v44 }
0x1e8a   :  { %v1086_v47 = vmul.f32 0.5, %v1085_v46 }
0x1e8c   :  { %v1087_v49 = vsel %vm1540_vm5, %v1085_v46, %v1086_v47 }
0x1e8d   :  { %1299 = vtanh.f32 %v1087_v49 }
0x1e93   :  { %v1300_v50 = vpop.eup %1299 }
0x1e94   :  { %v1089_v51 = vmul.f32 0.5, %v1300_v50 }
0x1e96   :  { %v1090_v52 = vadd.f32 0.5, %v1089_v51 }
0x1e98   :  { %v1091_v53 = vsel %vm1540_vm5, %v1300_v50, %v1090_v52 }
0x1e99   :  { %1094 = vrot.lane.b32.xlu2 %v1091_v53, %s1377_s6  ;;  %v1092_v56 = vmul.f32 %v1091_v53, %v1053_v33 }
0x1ea1   :  { %1112 = vrot.lane.b32.xlu2 %v1237_v48, %s1379_s0 }
0x1ef3   :  { %v1095_v54 = vpop.permute.xlu2 %1094 }
0x1ef4   :  { %v1097_v55 = vmul.f32 %v1095_v54, %v1091_v53 }
0x1ef6   :  { %1099 = vrot.lane.b32.xlu0 %v1097_v55, %s1378_s23 }
0x1efb   :  { %v1113_v60 = vpop.permute.xlu2 %1112 }
0x1f68   :  { %v1100_v57 = vpop.permute.xlu0 %1099 }
0x1f69   :  { %v1102_v58 = vadd.f32 %v1100_v57, %v1092_v56 }
0x1f6b   :  { %1301 = vtanh.f32 %v1102_v58 }
0x1f71   :  { %v1302_v59 = vpop.eup %1301 }
0x1f72   :  { %1105 = vrot.lane.b32.xlu1 %v1302_v59, %s1377_s6 }
0x1fe4   :  { %v1106_v22 = vpop.permute.xlu1 %1105 }
0x1fe5   :  { %v1108_v61 = vmul.f32 %v1106_v22, %v1091_v53 }
0x1fe7   :  { %v1115_v62 = vmul.f32 %v1113_v60, %v1108_v61  ;;  %1134 = vrot.lane.b32.xlu2 %v1108_v61, %s1377_s6 }
0x1fe9   :  { %1117 = vrot.lane.b32.xlu0 %v1115_v62, %s1378_s23 }
0x1fef   :  { %1142 = vrot.lane.b32.xlu2 %v1102_v58, %s1377_s6 }
0x1ff1   :  { %1138 = vrot.lane.b32.xlu0 %v644_v23, %s1378_s23 }
0x2041   :  { %v1135_v63 = vpop.permute.xlu2 %1134 }
0x2042   :  { %v1145_v4 = vsel %vm88_vm0, %v665_v34, %v1135_v63 }
0x2049   :  { %v1143_v10 = vpop.permute.xlu2 %1142 }
0x205b   :  { %v1118_v0 = vpop.permute.xlu0 %1117 }
0x205c   :  { %v1120_v3 = vsel %vm88_vm0, %v1118_v0, 0.0 }
0x205d   :  { %1121 = vadd.xlane.f32.xlu1 %v1120_v3 }
0x2063   :  { %v1139_v7 = vpop.permute.xlu0 %1138 }
0x2064   :  { %v1147_v1 = vsel %vm1146_vm6, %v1145_v4, %v1139_v7 }
0x2065   :  { %v1149_v2 = vsel %vm1148_vm7, %v1147_v1, %v1143_v10 }
0x2066   :  { %1152 = vst [vmem:[%s1881_s12] sm:$0xff] %v1149_v2 }
0x20d0   :  { %v1122_v5 = vpop.xlane.xlu1 %1121 }
0x20d1   :  { %v1127_v27 = vadd.f32 %v1238_v16, %v1122_v5 }
0x20d3   :  { %v1128_v6 = vmul.f32 0.5, %v1127_v27 }
0x20d5   :  { %1303 = vtanh.f32 %v1128_v6 }
0x20db   :  { %v1304_v8 = vpop.eup %1303 }
0x20dc   :  { %v1130_v9 = vmul.f32 0.5, %v1304_v8 }
0x20de   :  { %v1131_v11 = vadd.f32 0.5, %v1130_v9 }
0x20e0   :  { %v1151_v12 = vsel %vm1150_vm8, %v1131_v11, 0.0 }
0x20e1   :  { %1153 = vst [vmem:[%s1881_s12 + $0x8] sm:$0xff] %v1151_v12 }
0x20e2   :  { %1158 = vsyncpa [#allocation5], 1 }
0x20e3   :  { %1159 = vsyncpa [#allocation9], 1 }
0x20e4   :  { %1160 = vsyncpa [#allocation6], 1 }

</bundles_post_ra>
